<compile_context>
chip_gen: v7x
topology: tpu7x:2x2x1
jax: 0.10.0
libtpu: 0.0.40
codegen_flags: <defaults>
</compile_context>

<pallas_src>
import functools

import numpy as np
import jax
import jax.numpy as jnp
from jax.experimental import pallas as pl
from jax.experimental.pallas import tpu as pltpu


# ----------------------------- Pallas kernel -------------------------------- #
def _veckm_kernel(ptsq_ref, ptskT_ref, eabk_ref, eaq_ref, epq_ref, out_ref, qq_ref,
                  *, beta2, sqrt_d, d_pad, tk, use_pe, resident_ea):
    k = pl.program_id(2)
    nk = pl.num_programs(2)

    pq = ptsq_ref[0]                       # (Tq, 3)  f32 query points (resident over k)
    pkt = ptskT_ref[0]                     # (3, Tk)  f32 key points, transposed (lane-dense)

    @pl.when(k == 0)
    def _init():
        out_ref[...] = jnp.zeros_like(out_ref)                         # [jr | ji] accumulator
        qq_ref[...] = jnp.sum(pq * pq, axis=-1, keepdims=True)         # |pq|^2 hoisted out of k loop

    # ---- pairwise squared distances via the Gram identity (lane-dense) ----
    # cross term as 3 VPU broadcast-FMAs (no pk.T transpose, MXU stays free for the big matmul)
    kk = jnp.sum(pkt * pkt, axis=0, keepdims=True)                     # (1, Tk)
    cross = (pq[:, 0:1] * pkt[0:1, :]
             + pq[:, 1:2] * pkt[1:2, :]
             + pq[:, 2:3] * pkt[2:3, :])                               # (Tq, Tk)
    d2 = jnp.maximum(qq_ref[...] + kk - 2.0 * cross, 0.0)              # clamp f32 rounding
    j = jnp.exp(-beta2 * d2).astype(jnp.bfloat16)                      # bf16 MXU operand; exp stays f32 (v5e-safe)

    # ---- key-side eA tile: precomputed [cos | sin] table (bf16) ----
    if resident_ea:
        koff = pl.multiple_of(k * tk, tk)
        eabk = eabk_ref[0, pl.ds(koff, tk), :]                         # slice of per-batch resident slab
    else:
        eabk = eabk_ref[0]                                             # pipelined key tile

    # ---- single fused bf16 MXU matmul J @ [cos | sin], accumulated into out_ref ----
    out_ref[0] = out_ref[0] + jnp.dot(j, eabk, preferred_element_type=jnp.float32)

    @pl.when(k == nk - 1)
    def _finalize():
        acc = out_ref[0]
        jr = acc[:, :d_pad]
        ji = acc[:, d_pad:]

        # query-side cos/sin (f32, precomputed in the wrapper)
        ca = eaq_ref[0, :, :d_pad]
        sa = eaq_ref[0, :, d_pad:]

        # (J @ eA) / eA  ==  (J @ eA) * conj(eA)   since |eA| == 1
        gr = jr * ca + ji * sa
        gi = ji * ca - jr * sa

        # padded columns of the cos/sin tables are zero, so they contribute 0 here
        # and the row norm over d_pad equals the norm over the real d columns.
        scale = sqrt_d * jax.lax.rsqrt(jnp.sum(gr * gr + gi * gi, axis=-1, keepdims=True))
        gr = gr * scale
        gi = gi * scale

        if use_pe:
            gr = gr + epq_ref[0, :, :d_pad]
            gi = gi + epq_ref[0, :, d_pad:]

        # two slice stores (no concatenate temp); last dim 2*d_pad is 128-aligned
        out_ref[0, :, :d_pad] = gr
        out_ref[0, :, d_pad:] = gi


# ------------------------------ helpers -------------------------------------- #
def _phases(pts, M):
    """pts: (B, N, 3), M: (3, d) -> pts @ M as 3 exact f32 broadcast-FMAs."""
    return pts[..., 0:1] * M[0] + pts[..., 1:2] * M[1] + pts[..., 2:3] * M[2]


def _pick_tile(n, cap):
    for t in (1024, 512, 256, 128, 64, 32, 16, 8):
        if t <= cap and t <= n and n % t == 0:
            return t
    return n


def _vmem_limit(N, tq, tk, d_pad, resident_ea, phys_vmem):
    two_d = 2 * d_pad
    kblk = N if resident_ea else tk
    need = (
        2 * kblk * two_d * 2                  # key eA (bf16), double-buffered
        + 2 * 2 * tq * two_d * 4              # query eA + eP blocks (f32), double-buffered
        + 2 * tq * two_d * 4                  # output block (f32), double-buffered
        + 2 * (tq * 3 + 3 * tk) * 4           # point tiles
        + 2 * tq * two_d * 4                  # finalize temporaries (gr, gi)
        + 4 * tq * tk * 4                     # cross / d2 / j temporaries
        + tq * 128 * 4                        # qq scratch (lane-padded)
    )
    return int(min(max(need * 3 // 2, 24 * 1024 * 1024), int(phys_vmem * 0.9)))


# ------------------------------ wrapper --------------------------------------- #
def veckm_forward(pts, A, P=None, *, beta, positional_encoding=True, tq=None, tk=None):
    """Pallas VecKM forward.  pts: (B, N, 3) f32, A/P: (3, d) f32 -> (B, N, d) complex64."""
    B, N, _ = pts.shape
    d = A.shape[-1]
    beta2 = float(beta) ** 2 / 2.0
    sqrt_d = float(d) ** 0.5

    # Pad the feature dim so the stored last dim (2*d_pad) is a multiple of 128.
    d_pad = max(64, ((d + 63) // 64) * 64)
    pad = d_pad - d
    zp = ((0, 0), (0, 0), (0, pad))

    # ---- precompute phase tables once (O(B*N*d)), instead of per key-tile in-kernel ----
    thA = _phases(pts, A)
    cosA, sinA = jnp.cos(thA), jnp.sin(thA)
    if pad:
        cosA, sinA = jnp.pad(cosA, zp), jnp.pad(sinA, zp)       # zero pad cols -> no norm mask needed
    ea_q = jnp.concatenate([cosA, sinA], axis=-1)               # (B, N, 2*d_pad) f32, query side
    ea_k = ea_q.astype(jnp.bfloat16)                            # key side: bf16 MXU operand

    if positional_encoding:
        thP = _phases(pts, P)
        cosP, sinP = jnp.cos(thP), jnp.sin(thP)
        if pad:
            cosP, sinP = jnp.pad(cosP, zp), jnp.pad(sinP, zp)
        ep_q = jnp.concatenate([cosP, sinP], axis=-1)
    else:
        ep_q = ea_q                                             # dummy; never read when use_pe=False

    pts_t = jnp.transpose(pts, (0, 2, 1))                       # (B, 3, N) lane-dense key layout

    # ---- tile selection ----
    if tq is None:
        tq = _pick_tile(N, cap=256)
    # v7x has 2 TensorCores sharing the parallel grid axes: keep B*(N/tq) >= 2.
    while tq >= 16 and tq % 2 == 0 and N % (tq // 2) == 0 and B * (N // tq) < 2:
        tq //= 2
    if tk is None:
        tk = N
        for t in (1024, 512, 256, 128):
            if t <= N and N % t == 0:
                tk = t
                break
    assert N % tq == 0 and N % tk == 0, "N must be divisible by the tile sizes"
    assert tq % 8 == 0 or tq == N
    assert tk % 128 == 0 or tk == N, "tk must be a multiple of 128 (or the full N)"

    # ---- VMEM sizing: resident per-batch eA when it fits, pipelined key tiles otherwise ----
    try:
        phys_vmem = int(pltpu.get_tpu_info().vmem_capacity_bytes)
    except Exception:  # pragma: no cover - conservative fallback (v7x has 64 MiB per TC)
        phys_vmem = 64 * 1024 * 1024
    resident_ea = (2 * N * 2 * d_pad * 2) <= phys_vmem // 3

    if resident_ea:
        eabk_spec = pl.BlockSpec((1, N, 2 * d_pad), lambda b, q, k: (b, 0, 0))
    else:
        eabk_spec = pl.BlockSpec((1, tk, 2 * d_pad), lambda b, q, k: (b, k, 0))

    kernel = functools.partial(
        _veckm_kernel, beta2=beta2, sqrt_d=sqrt_d, d_pad=d_pad, tk=tk,
        use_pe=positional_encoding, resident_ea=resident_ea)

    out = pl.pallas_call(
        kernel,
        out_shape=jax.ShapeDtypeStruct((B, N, 2 * d_pad), jnp.float32),
        grid_spec=pltpu.PrefetchScalarGridSpec(
            num_scalar_prefetch=0,
            grid=(B, N // tq, N // tk),
            in_specs=[
                pl.BlockSpec((1, tq, 3), lambda b, q, k: (b, q, 0)),          # query points
                pl.BlockSpec((1, 3, tk), lambda b, q, k: (b, 0, k)),          # key points (transposed)
                eabk_spec,                                                    # key [cos|sin] (bf16)
                pl.BlockSpec((1, tq, 2 * d_pad), lambda b, q, k: (b, q, 0)),  # query [cos|sin] (f32)
                pl.BlockSpec((1, tq, 2 * d_pad), lambda b, q, k: (b, q, 0)),  # query eP [cos|sin] (f32)
            ],
            out_specs=pl.BlockSpec((1, tq, 2 * d_pad), lambda b, q, k: (b, q, 0)),
            scratch_shapes=[pltpu.VMEM((tq, 1), jnp.float32)],                # |pq|^2, hoisted over k
        ),
        compiler_params=pltpu.CompilerParams(
            dimension_semantics=("parallel", "parallel", "arbitrary"),
            vmem_limit_bytes=_vmem_limit(N, tq, tk, d_pad, resident_ea, phys_vmem),
        ),
    )(pts, pts_t, ea_k, ea_q, ep_q)

    gr = out[..., :d]
    gi = out[..., d_pad:d_pad + d]
    return jax.lax.complex(gr, gi)          # complex64, shape (B, N, d)


# ------------------------- deterministic parameters -------------------------- #
def strict_standard_normal(d, key):
    # JAX equivalent of the torch init: inverse-CDF N(0,1) samples at evenly spaced
    # quantiles, deterministically shuffled.
    # TODO(synk): not bit-identical to scipy.stats.norm.ppf + np.random.shuffle.
    y = jnp.linspace(0.0, 1.0, d + 2)[1:-1]
    x = jnp.sqrt(2.0) * jax.scipy.special.erfinv(2.0 * y - 1.0)
    return jax.random.permutation(key, x).astype(jnp.float32)


def init_veckm_params(d, alpha, key):
    keys = jax.random.split(key, 6)
    A = jnp.stack([strict_standard_normal(d, keys[i]) for i in range(3)], axis=0) * alpha
    P = jnp.stack([strict_standard_normal(d, keys[3 + i]) for i in range(3)], axis=0)
    return A.astype(jnp.float32), P.astype(jnp.float32)


# ------------------------------ pure-JAX reference --------------------------- #
def veckm_reference(pts, A, P, *, beta, positional_encoding=True):
    d = A.shape[-1]
    beta2 = float(beta) ** 2 / 2.0
    sqrt_d = float(d) ** 0.5
    hp = jax.lax.Precision.HIGHEST
    D2 = jnp.sum((pts[:, :, None, :] - pts[:, None, :, :]) ** 2, axis=-1)
    J = jnp.exp(-beta2 * D2)
    th = _phases(pts, A)
    eAr, eAi = jnp.cos(th), jnp.sin(th)
    num = (jnp.matmul(J, eAr, precision=hp)
           + 1j * jnp.matmul(J, eAi, precision=hp)).astype(jnp.complex64)
    eA = (eAr + 1j * eAi).astype(jnp.complex64)
    G = num / eA
    G = G / jnp.linalg.norm(G, axis=-1, keepdims=True) * sqrt_d
    if positional_encoding:
        thP = _phases(pts, P)
        G = G + (jnp.cos(thP) + 1j * jnp.sin(thP)).astype(jnp.complex64)
    return G


# ----------------------------------- main ------------------------------------ #
if __name__ == "__main__":
    key = jax.random.PRNGKey(0)
    k_pts, k_param = jax.random.split(key)

    B, N, d = 2, 256, 64
    alpha, beta = 3.0, 1.5

    pts = jax.random.normal(k_pts, (B, N, 3), dtype=jnp.float32)
    A, P = init_veckm_params(d, alpha, k_param)

    # tq=tk=128 -> grid (2, 2, 2): exercises the tiled key-axis accumulation path.
    G = veckm_forward(pts, A, P, beta=beta, positional_encoding=True, tq=128, tk=128)
    G = jax.block_until_ready(G)

    G_ref = veckm_reference(pts, A, P, beta=beta, positional_encoding=True)
    # The dominant matmul uses bf16 MXU operands (f32 accumulation), so the kernel
    # carries ~1e-2-level noise vs the f32-highest reference; tolerance set accordingly.
    np.testing.assert_allclose(np.asarray(G), np.asarray(G_ref), rtol=2e-2, atol=4e-2)

    print("KERNEL_OK")
</pallas_src>

<mosaic_0001>
module attributes {stable_mosaic.version = 11 : i64} {
  func.func @_veckm_kernel(%arg0: i32, %arg1: i32, %arg2: i32, %arg3: memref<1x128x3xf32, #tpu.memory_space<vmem>>, %arg4: memref<1x3x128xf32, #tpu.memory_space<vmem>>, %arg5: memref<1x256x128xbf16, #tpu.memory_space<vmem>>, %arg6: memref<1x128x128xf32, #tpu.memory_space<vmem>>, %arg7: memref<1x128x128xf32, #tpu.memory_space<vmem>>, %arg8: memref<1x128x128xf32, #tpu.memory_space<vmem>>, %arg9: memref<128x1xf32, #tpu.memory_space<vmem>>) attributes {dimension_semantics = [#tpu.dimension_semantics<parallel>, #tpu.dimension_semantics<parallel>, #tpu.dimension_semantics<arbitrary>], iteration_bounds = array<i64: 2, 2, 2>, scalar_prefetch = 0 : i64, scratch_operands = 1 : i64, tpu.core_type = #tpu.core_type<tc>, window_params = [{transform_indices = @transform_0, window_bounds = array<i64: 1, 128, 3>}, {transform_indices = @transform_1, window_bounds = array<i64: 1, 3, 128>}, {transform_indices = @transform_2, window_bounds = array<i64: 1, 256, 128>}, {transform_indices = @transform_3, window_bounds = array<i64: 1, 128, 128>}, {transform_indices = @transform_4, window_bounds = array<i64: 1, 128, 128>}, {transform_indices = @transform_5, window_bounds = array<i64: 1, 128, 128>}]} {
    %c0 = arith.constant 0 : index
    %c0_0 = arith.constant 0 : index
    %c0_1 = arith.constant 0 : index
    %0 = vector.load %arg3[%c0, %c0_0, %c0_1] : memref<1x128x3xf32, #tpu.memory_space<vmem>>, vector<1x128x3xf32>
    %1 = vector.shape_cast %0 : vector<1x128x3xf32> to vector<128x3xf32>
    %c0_2 = arith.constant 0 : index
    %c0_3 = arith.constant 0 : index
    %c0_4 = arith.constant 0 : index
    %2 = vector.load %arg4[%c0_2, %c0_3, %c0_4] : memref<1x3x128xf32, #tpu.memory_space<vmem>>, vector<1x3x128xf32>
    %3 = vector.shape_cast %2 : vector<1x3x128xf32> to vector<3x128xf32>
    %c0_i32 = arith.constant 0 : i32
    %4 = arith.cmpi eq, %arg2, %c0_i32 : i32
    %5 = arith.extui %4 : i1 to i32
    %c0_i32_5 = arith.constant 0 : i32
    %6 = arith.cmpi ne, %5, %c0_i32_5 : i32
    scf.if %6 {
      %cst_21 = arith.constant 0.000000e+00 : f32
      %55 = vector.broadcast %cst_21 : f32 to vector<1x128x128xf32>
      %c0_22 = arith.constant 0 : index
      %c0_23 = arith.constant 0 : index
      %c0_24 = arith.constant 0 : index
      %56 = vector.load %arg8[%c0_22, %c0_23, %c0_24] : memref<1x128x128xf32, #tpu.memory_space<vmem>>, vector<1x128x128xf32>
      tpu.vector_store %arg8[%c0_22, %c0_23, %c0_24], %55 {strides = array<i32>} : memref<1x128x128xf32, #tpu.memory_space<vmem>>, vector<1x128x128xf32>,
      %57 = arith.mulf %1, %1 : vector<128x3xf32>
      %cst_25 = arith.constant dense<0.000000e+00> : vector<128xf32>
      %58 = vector.multi_reduction <add>, %57, %cst_25 [1] : vector<128x3xf32> to vector<128xf32>
      %59 = vector.shape_cast %58 : vector<128xf32> to vector<128x1xf32>
      %c0_26 = arith.constant 0 : index
      %c0_27 = arith.constant 0 : index
      %60 = vector.load %arg9[%c0_26, %c0_27] : memref<128x1xf32, #tpu.memory_space<vmem>>, vector<128x1xf32>
      tpu.vector_store %arg9[%c0_26, %c0_27], %59 {strides = array<i32>} : memref<128x1xf32, #tpu.memory_space<vmem>>, vector<128x1xf32>,
    } else {
    }
    %7 = arith.mulf %3, %3 : vector<3x128xf32>
    %cst = arith.constant dense<0.000000e+00> : vector<128xf32>
    %8 = vector.multi_reduction <add>, %7, %cst [0] : vector<3x128xf32> to vector<128xf32>
    %9 = vector.shape_cast %8 : vector<128xf32> to vector<1x128xf32>
    %10 = vector.extract_strided_slice %1 {offsets = [0, 0], sizes = [128, 1], strides = [1, 1]} : vector<128x3xf32> to vector<128x1xf32>
    %11 = vector.extract_strided_slice %3 {offsets = [0, 0], sizes = [1, 128], strides = [1, 1]} : vector<3x128xf32> to vector<1x128xf32>
    %12 = vector.broadcast %10 : vector<128x1xf32> to vector<128x128xf32>
    %13 = vector.broadcast %11 : vector<1x128xf32> to vector<128x128xf32>
    %14 = arith.mulf %12, %13 : vector<128x128xf32>
    %15 = vector.extract_strided_slice %1 {offsets = [0, 1], sizes = [128, 1], strides = [1, 1]} : vector<128x3xf32> to vector<128x1xf32>
    %16 = vector.extract_strided_slice %3 {offsets = [1, 0], sizes = [1, 128], strides = [1, 1]} : vector<3x128xf32> to vector<1x128xf32>
    %17 = vector.broadcast %15 : vector<128x1xf32> to vector<128x128xf32>
    %18 = vector.broadcast %16 : vector<1x128xf32> to vector<128x128xf32>
    %19 = arith.mulf %17, %18 : vector<128x128xf32>
    %20 = arith.addf %14, %19 : vector<128x128xf32>
    %21 = vector.extract_strided_slice %1 {offsets = [0, 2], sizes = [128, 1], strides = [1, 1]} : vector<128x3xf32> to vector<128x1xf32>
    %22 = vector.extract_strided_slice %3 {offsets = [2, 0], sizes = [1, 128], strides = [1, 1]} : vector<3x128xf32> to vector<1x128xf32>
    %23 = vector.broadcast %21 : vector<128x1xf32> to vector<128x128xf32>
    %24 = vector.broadcast %22 : vector<1x128xf32> to vector<128x128xf32>
    %25 = arith.mulf %23, %24 : vector<128x128xf32>
    %26 = arith.addf %20, %25 : vector<128x128xf32>
    %c0_6 = arith.constant 0 : index
    %c0_7 = arith.constant 0 : index
    %27 = vector.load %arg9[%c0_6, %c0_7] : memref<128x1xf32, #tpu.memory_space<vmem>>, vector<128x1xf32>
    %28 = vector.broadcast %27 : vector<128x1xf32> to vector<128x128xf32>
    %29 = vector.broadcast %9 : vector<1x128xf32> to vector<128x128xf32>
    %30 = arith.addf %28, %29 : vector<128x128xf32>
    %cst_8 = arith.constant 2.000000e+00 : f32
    %31 = vector.broadcast %cst_8 : f32 to vector<128x128xf32>
    %32 = arith.mulf %31, %26 : vector<128x128xf32>
    %33 = arith.subf %30, %32 : vector<128x128xf32>
    %cst_9 = arith.constant 0.000000e+00 : f32
    %34 = vector.broadcast %cst_9 : f32 to vector<128x128xf32>
    %35 = arith.maximumf %33, %34 : vector<128x128xf32>
    %cst_10 = arith.constant -1.125000e+00 : f32
    %36 = vector.broadcast %cst_10 : f32 to vector<128x128xf32>
    %37 = arith.mulf %36, %35 : vector<128x128xf32>
    %38 = math.exp %37 : vector<128x128xf32>
    %39 = arith.truncf %38 : vector<128x128xf32> to vector<128x128xbf16>
    %c128_i32 = arith.constant 128 : i32
    %40 = arith.muli %arg2, %c128_i32 : i32
    %41 = tpu.assume_multiple %40, 128 : i32
    %c0_11 = arith.constant 0 : index
    %42 = arith.index_cast %41 : i32 to index
    %c0_12 = arith.constant 0 : index
    %43 = vector.load %arg5[%c0_11, %42, %c0_12] : memref<1x256x128xbf16, #tpu.memory_space<vmem>>, vector<1x128x128xbf16>
    %44 = vector.shape_cast %43 : vector<1x128x128xbf16> to vector<128x128xbf16>
    %c0_13 = arith.constant 0 : index
    %c0_14 = arith.constant 0 : index
    %c0_15 = arith.constant 0 : index
    %45 = vector.load %arg8[%c0_13, %c0_14, %c0_15] : memref<1x128x128xf32, #tpu.memory_space<vmem>>, vector<1x128x128xf32>
    %46 = vector.shape_cast %45 : vector<1x128x128xf32> to vector<128x128xf32>
    %cst_16 = arith.constant dense<0.000000e+00> : vector<128x128xf32>
    %47 = tpu.matmul %39, %44, %cst_16 {dimension_numbers = #tpu.dot_dimension_numbers<[1], [0], [0], [1], [0, 0, 1, 1], [], []>} : vector<128x128xbf16>, vector<128x128xbf16>, vector<128x128xf32> -> vector<128x128xf32>
    %48 = arith.addf %46, %47 : vector<128x128xf32>
    %c0_17 = arith.constant 0 : index
    %c0_18 = arith.constant 0 : index
    %c0_19 = arith.constant 0 : index
    %49 = vector.load %arg8[%c0_17, %c0_18, %c0_19] : memref<1x128x128xf32, #tpu.memory_space<vmem>>, vector<1x128x128xf32>
    %50 = vector.shape_cast %49 : vector<1x128x128xf32> to vector<128x128xf32>
    %51 = vector.shape_cast %48 : vector<128x128xf32> to vector<1x128x128xf32>
    tpu.vector_store %arg8[%c0_17, %c0_18, %c0_19], %51 {strides = array<i32>} : memref<1x128x128xf32, #tpu.memory_space<vmem>>, vector<1x128x128xf32>,
    %c1_i32 = arith.constant 1 : i32
    %52 = arith.cmpi eq, %arg2, %c1_i32 : i32
    %53 = arith.extui %52 : i1 to i32
    %c0_i32_20 = arith.constant 0 : i32
    %54 = arith.cmpi ne, %53, %c0_i32_20 : i32
    scf.if %54 {
      %c0_21 = arith.constant 0 : index
      %c0_22 = arith.constant 0 : index
      %c0_23 = arith.constant 0 : index
      %55 = vector.load %arg8[%c0_21, %c0_22, %c0_23] : memref<1x128x128xf32, #tpu.memory_space<vmem>>, vector<1x128x128xf32>
      %56 = vector.shape_cast %55 : vector<1x128x128xf32> to vector<128x128xf32>
      %57 = vector.extract_strided_slice %56 {offsets = [0, 0], sizes = [128, 64], strides = [1, 1]} : vector<128x128xf32> to vector<128x64xf32>
      %58 = vector.extract_strided_slice %56 {offsets = [0, 64], sizes = [128, 64], strides = [1, 1]} : vector<128x128xf32> to vector<128x64xf32>
      %c0_24 = arith.constant 0 : index
      %c0_25 = arith.constant 0 : index
      %c0_26 = arith.constant 0 : index
      %59 = vector.load %arg6[%c0_24, %c0_25, %c0_26] : memref<1x128x128xf32, #tpu.memory_space<vmem>>, vector<1x128x64xf32>
      %60 = vector.shape_cast %59 : vector<1x128x64xf32> to vector<128x64xf32>
      %c0_27 = arith.constant 0 : index
      %c0_28 = arith.constant 0 : index
      %c64 = arith.constant 64 : index
      %61 = vector.load %arg6[%c0_27, %c0_28, %c64] : memref<1x128x128xf32, #tpu.memory_space<vmem>>, vector<1x128x64xf32>
      %62 = vector.shape_cast %61 : vector<1x128x64xf32> to vector<128x64xf32>
      %63 = arith.mulf %57, %60 : vector<128x64xf32>
      %64 = arith.mulf %58, %62 : vector<128x64xf32>
      %65 = arith.addf %63, %64 : vector<128x64xf32>
      %66 = arith.mulf %58, %60 : vector<128x64xf32>
      %67 = arith.mulf %57, %62 : vector<128x64xf32>
      %68 = arith.subf %66, %67 : vector<128x64xf32>
      %69 = arith.mulf %65, %65 : vector<128x64xf32>
      %70 = arith.mulf %68, %68 : vector<128x64xf32>
      %71 = arith.addf %69, %70 : vector<128x64xf32>
      %cst_29 = arith.constant dense<0.000000e+00> : vector<128xf32>
      %72 = vector.multi_reduction <add>, %71, %cst_29 [1] : vector<128x64xf32> to vector<128xf32>
      %73 = vector.shape_cast %72 : vector<128xf32> to vector<128x1xf32>
      %74 = math.rsqrt %73 : vector<128x1xf32>
      %cst_30 = arith.constant 8.000000e+00 : f32
      %75 = vector.broadcast %cst_30 : f32 to vector<128x1xf32>
      %76 = arith.mulf %75, %74 : vector<128x1xf32>
      %77 = vector.broadcast %76 : vector<128x1xf32> to vector<128x64xf32>
      %78 = arith.mulf %65, %77 : vector<128x64xf32>
      %79 = vector.broadcast %76 : vector<128x1xf32> to vector<128x64xf32>
      %80 = arith.mulf %68, %79 : vector<128x64xf32>
      %c0_31 = arith.constant 0 : index
      %c0_32 = arith.constant 0 : index
      %c0_33 = arith.constant 0 : index
      %81 = vector.load %arg7[%c0_31, %c0_32, %c0_33] : memref<1x128x128xf32, #tpu.memory_space<vmem>>, vector<1x128x64xf32>
      %82 = vector.shape_cast %81 : vector<1x128x64xf32> to vector<128x64xf32>
      %83 = arith.addf %78, %82 : vector<128x64xf32>
      %c0_34 = arith.constant 0 : index
      %c0_35 = arith.constant 0 : index
      %c64_36 = arith.constant 64 : index
      %84 = vector.load %arg7[%c0_34, %c0_35, %c64_36] : memref<1x128x128xf32, #tpu.memory_space<vmem>>, vector<1x128x64xf32>
      %85 = vector.shape_cast %84 : vector<1x128x64xf32> to vector<128x64xf32>
      %86 = arith.addf %80, %85 : vector<128x64xf32>
      %c0_37 = arith.constant 0 : index
      %c0_38 = arith.constant 0 : index
      %c0_39 = arith.constant 0 : index
      %87 = vector.load %arg8[%c0_37, %c0_38, %c0_39] : memref<1x128x128xf32, #tpu.memory_space<vmem>>, vector<1x128x64xf32>
      %88 = vector.shape_cast %87 : vector<1x128x64xf32> to vector<128x64xf32>
      %89 = vector.shape_cast %83 : vector<128x64xf32> to vector<1x128x64xf32>
      tpu.vector_store %arg8[%c0_37, %c0_38, %c0_39], %89 {strides = array<i32>} : memref<1x128x128xf32, #tpu.memory_space<vmem>>, vector<1x128x64xf32>,
      %c0_40 = arith.constant 0 : index
      %c0_41 = arith.constant 0 : index
      %c64_42 = arith.constant 64 : index
      %90 = vector.load %arg8[%c0_40, %c0_41, %c64_42] : memref<1x128x128xf32, #tpu.memory_space<vmem>>, vector<1x128x64xf32>
      %91 = vector.shape_cast %90 : vector<1x128x64xf32> to vector<128x64xf32>
      %92 = vector.shape_cast %86 : vector<128x64xf32> to vector<1x128x64xf32>
      tpu.vector_store %arg8[%c0_40, %c0_41, %c64_42], %92 {strides = array<i32>} : memref<1x128x128xf32, #tpu.memory_space<vmem>>, vector<1x128x64xf32>,
    } else {
    }
    return
  }
  func.func @transform_0(%arg0: i32, %arg1: i32, %arg2: i32) -> (i32, i32, i32) {
    %c0_i32 = arith.constant 0 : i32
    %c0_i32_0 = arith.constant 0 : i32
    return %arg0, %arg1, %c0_i32 : i32, i32, i32
  }
  func.func @transform_1(%arg0: i32, %arg1: i32, %arg2: i32) -> (i32, i32, i32) {
    %c0_i32 = arith.constant 0 : i32
    %c0_i32_0 = arith.constant 0 : i32
    return %arg0, %c0_i32, %arg2 : i32, i32, i32
  }
  func.func @transform_2(%arg0: i32, %arg1: i32, %arg2: i32) -> (i32, i32, i32) {
    %c0_i32 = arith.constant 0 : i32
    %c0_i32_0 = arith.constant 0 : i32
    %c0_i32_1 = arith.constant 0 : i32
    return %arg0, %c0_i32, %c0_i32_0 : i32, i32, i32
  }
  func.func @transform_3(%arg0: i32, %arg1: i32, %arg2: i32) -> (i32, i32, i32) {
    %c0_i32 = arith.constant 0 : i32
    %c0_i32_0 = arith.constant 0 : i32
    return %arg0, %arg1, %c0_i32 : i32, i32, i32
  }
  func.func @transform_4(%arg0: i32, %arg1: i32, %arg2: i32) -> (i32, i32, i32) {
    %c0_i32 = arith.constant 0 : i32
    %c0_i32_0 = arith.constant 0 : i32
    return %arg0, %arg1, %c0_i32 : i32, i32, i32
  }
  func.func @transform_5(%arg0: i32, %arg1: i32, %arg2: i32) -> (i32, i32, i32) {
    %c0_i32 = arith.constant 0 : i32
    %c0_i32_0 = arith.constant 0 : i32
    return %arg0, %arg1, %c0_i32 : i32, i32, i32
  }
}

</mosaic_0001>

<bundles_post_ra>
// kernel: tpu_custom_call.1
= control target key start
LH: loop header
LB: loop body
LE: loop exit
PB: predicated region body
PF: predicated region fallthrough
CT: control target
= control target key end

     0   :  { %s3895_s0 = inlined_call_operand.vmem [shape: f32[2,256,3], index: 0, kind: input, shape index: {}]   ;;  %s3896_s1 = inlined_call_operand.vmem [shape: f32[2,3,256], index: 1, kind: input, shape index: {}]   ;;  %s3897_s2 = inlined_call_operand.hbm [shape: bf16[2,256,128], index: 2, kind: input, shape index: {}]   ;;  %s3898_s3 = inlined_call_operand.vmem [shape: f32[2,256,128], index: 3, kind: input, shape index: {}]   ;;  %s3899_s4 = inlined_call_operand.hbm [shape: f32[2,256,128], index: 4, kind: input, shape index: {}]   ;;  %s3900_s5 = inlined_call_operand.hbm [shape: f32[2,256,128], index: 5, kind: output, shape index: {}]  }
   0x1   :  { %3918 = sst [smem:[#allocation21_spill]] %s3895_s0 }
   0x2   :  { %3919 = sst [smem:[#allocation22_spill]] %s3896_s1 }
   0x3   :  { %3920 = sst [smem:[#allocation23_spill]] %s3897_s2 }
   0x4   :  { %3921 = sst [smem:[#allocation24_spill]] %s3898_s3 }
   0x5   :  { %3922 = sst [smem:[#allocation25_spill]] %s3900_s5 }
   0x6   :  { %10 = vsyncpa [#allocation4], 0 }
   0x7   :  { %12 = vsyncpa [#allocation4 + $0x1], 0 }
   0x8   :  { %13 = vsyncpa [#allocation7], 0 }
   0x9   :  { %15 = vsyncpa [#allocation7 + $0x1], 0 }
   0xa   :  { %16 = vsyncpa [#allocation5], 0 }
   0xb   :  { %18 = vsyncpa [#allocation5 + $0x1], 0  ;;  %s2635_s18 = smov 0   ;;  %s2637_s19 = smov 0  }
   0xc   :  { %s2639_s20 = smov 0   ;;  %s2641_s21 = smov 0  }
   0xd   :  { %s2643_s22 = smov 0   ;;  %s2645_s23 = smov 0  }
   0xe   :  { %s2647_s24 = smov 0   ;;  %s2649_s25 = smov 0  }
   0xf   :  { %s2651_s26 = smov 0   ;;  %s2653_s27 = smov 0  }
  0x10   :  { %s2655_s28 = smov 0   ;;  %s2657_s29 = smov 0  }
  0x11   :  { %s2659_s30 = smov 0  }
  0x12 LB: > { %3923 = sst [smem:[#allocation12_spill]] %s2541_s18  ;;  %s3901_s6 = sadd.s32 4294967295, %s2589_s30   ;;  %s2589_s30 = sphi %s2659_s30, %s24_s30   ;;  %s2585_s29 = sphi %s2657_s29, %s3977_s29   ;;  %s2581_s28 = sphi %s2655_s28, %s3968_s28   ;;  %s2577_s27 = sphi %s2653_s27, %s3967_s27   ;;  %s2573_s26 = sphi %s2651_s26, %s3976_s26   ;;  %s2569_s25 = sphi %s2649_s25, %s3966_s25   ;;  %s2565_s24 = sphi %s2647_s24, %s3965_s24   ;;  %s2561_s23 = sphi %s2645_s23, %s3975_s23   ;;  %s2557_s22 = sphi %s2643_s22, %s3974_s22   ;;  %s2553_s21 = sphi %s2641_s21, %s3973_s21   ;;  %s2549_s20 = sphi %s2639_s20, %s3972_s20   ;;  %s2545_s19 = sphi %s2637_s19, %s3971_s19   ;;  %s2541_s18 = sphi %s2635_s18, %s3970_s18  }
  0x13   : > { %3924 = sst [smem:[#allocation13_spill]] %s2565_s24  ;;  %p113_p0 = scmp.ne.s32.totalorder %s2561_s23, %s2557_s22 }
  0x14   : > { %3925 = sst [smem:[#allocation14_spill]] %s2573_s26  ;;  %p3903_p1 = scmp.eq.s32.totalorder %s2589_s30, 0 }
  0x15   : > { %3926 = sst [smem:[#allocation15_spill]] %s2577_s27  ;;  %p119_p2 = scmp.ne.s32.totalorder %s2557_s22, %s2553_s21 }
  0x16   : > { %3927 = sst [smem:[#allocation16_spill]] %s2581_s28  ;;  %p2707_p3 = scmp.eq.s32.totalorder %s3901_s6, 0 }
  0x17   : > { %p115_p4 = por %p3903_p1, %p113_p0  ;;  %p3902_p5 = scmp.lt.s32.totalorder %s2589_s30, 8 }
  0x18   : > { %p2716_p6 = por %p2707_p3, %p119_p2  ;;  %s251_s11 = sand.u32 1, %s2561_s23  }
  0x19   : > { %s2065_s12 = sshll.u32 %s251_s11, 7  ;;  %s2102_s13 = sshll.u32 %s2585_s29, 11 }
  0x1a   : > { %s3929_s10 = scalar_select %p2716_p6, 1, 0 }
  0x1b   : > { %s3930_s2 = sld [smem:[#allocation23_spill]]  ;;  %s255_s17 = scalar_lea.vmem [#allocation3], %s2065_s12 }
  0x1c   : > { %s262_s21 = sshll.u32 %s255_s17, 4  ;;  %p2731_p7 = pnand %p3902_p5, %p115_p4  ;;  %s2727_s21 = int_to_ptr.vmem [resolvable:$true] %s262_s21 }
  0x1d   : > { %s2736_s7 = scalar_lea.sflag [#allocation4], %s251_s11 }
  0x1e   : > { %p2389_p10 = pneg %p2731_p7 }
  0x21   : > { %s2725_s16 = scalar_lea.hbm %s3930_s2, %s2102_s13  ;;  %s2392_s15 = scalar_lea.hbm %s3930_s2, 4096 }
  0x22   : > { %s2387_s13 = scalar_lea.hbm %s2725_s16, 2048  ;;  %p2393_p13 = scmp.lt.u32.totalorder %s2725_s16, %s3930_s2 }
  0x23   : > { %p2388_p9 = scmp.ne.s32.totalorder %s2725_s16, %s2387_s13  ;;  %p2394_p0 = scmp.lt.u32.totalorder %s2392_s15, %s2387_s13 }
  0x24   : > { %p2396_p4 = scmp.lt.u32.totalorder %s2387_s13, %s2725_s16 }
  0x25   : > { %p2390_p11 = pnand %p2389_p10, %p2388_p9  ;;  %p2395_p2 = por %p2394_p0, %p2393_p13 }
  0x27   : > { %p2391_p12 = pneg %p2390_p11  ;;  %p2397_p5 = por %p2396_p4, %p2395_p2 }
  0x29   : > { %p2398_p1 = pnand %p2397_p5, %p2391_p12 }
  0x2b   : > { %2401 = shalt.err (!%p2398_p1)
}
  0x2c   : > { %s2402_s11 = scalar_lea.vmem %s2727_s21, 2048  ;;  %s2591_s12 = smov [#allocation3]  }
  0x2d   : > { %p2403_p9 = scmp.ne.s32.totalorder %s2727_s21, %s2402_s11  ;;  %s2407_s14 = sshll.u32 %s2591_s12, 4  ;;  %s2408_s14 = int_to_ptr.vmem [resolvable:$false] %s2407_s14 }
  0x2e   : > { %s2409_s6 = scalar_lea.vmem %s2408_s14, 4096  ;;  %p2410_p6 = scmp.lt.s32.totalorder %s2727_s21, %s2408_s14 }
  0x2f   : > { %p2405_p11 = pnand %p2403_p9, %p2389_p10  ;;  %p2411_p13 = scmp.lt.s32.totalorder %s2409_s6, %s2402_s11 }
  0x31   : > { %p2406_p8 = pneg %p2405_p11  ;;  %p2412_p0 = por %p2411_p13, %p2410_p6 }
  0x33   : > { %p2413_p2 = pnand %p2412_p0, %p2406_p8 }
  0x35   : > { %2416 = shalt.err (!%p2413_p2)
}
  0x36   : > { %s2592_s13 = smov 64   ;;  %s2593_s15 = smov 4  }
  0x37   : > { %2176 = dma.hbm_to_vmem [thread:$0]  (!%p2731_p7), %s2725_s16, 2048, %s2727_s21, %s2736_s7, %s2592_s13, %s2592_s13, %s2593_s15  }
  0x38   : > { %p306_p1 = scmp.lt.s32.totalorder %s2589_s30, 9  ;;  %p3932_p5 = scmp.ge.s32.totalorder %s2589_s30, 1 }
  0x39   : > { %s2062_s11 = sadd.s32 4294967294, %s2589_s30   ;;  %s36_s12 = sadd.s32 1, %s2577_s27 }
  0x3a   : > { %p2767_p6 = pnand %p3932_p5, %p306_p1  ;;  %p37_p8 = scmp.ge.s32.totalorder %s36_s12, 2 }
  0x3b   : > { %s39_s14 = sadd.s32 1, %s2581_s28  ;;  %s162_s6 = sadd.s32 1, %s2549_s20 }
  0x3c   : > { %p169_p10 = scmp.ne.s32.totalorder %s2549_s20, %s2545_s19  ;;  %s3979_s12 = smov (%p37_p8, %s36_s12), 0 }
  0x3d   : > { %3934 = sst [smem:[#allocation17_spill]] %s3979_s12  ;;  %s3981_s14 = smov (!%p37_p8, %s39_s14), %s2581_s28 }
  0x3e   : > { %p3935_p7 = scmp.eq.s32.totalorder %s2589_s30, 0  ;;  %p175_p4 = scmp.ne.s32.totalorder %s2545_s19, %s2541_s18 }
  0x3f   : > { %p41_p9 = scmp.ge.s32.totalorder %s3981_s14, 2  ;;  %s3937_s8 = sadd.s32 4294967295, %s2589_s30  }
  0x40   : > { %p2782_p12 = por %p169_p10, %p3935_p7  ;;  %p201_p11 = scmp.eq.s32.totalorder %s3937_s8, 7 }
  0x41   : > { %p2792_p13 = por %p175_p4, %p2707_p3  ;;  %p207_p0 = scmp.eq.s32.totalorder %s2062_s11, 7 }
  0x42   : > { %s3983_s14 = smov (%p41_p9, %s3981_s14), 0  ;;  %s3940_s21 = sadd.s32 1, %s2585_s29 }
  0x43   : > { %s3938_s16 = scalar_select %p2792_p13, 1, 0 }
  0x44   : > { %3939 = sst [smem:[#allocation18_spill]] %s3983_s14  ;;  %s3985_s21 = smov (!%p41_p9, %s3940_s21), %s2585_s29 }
  0x45   : > { %s158_s13 = ssub.s32 %s2581_s28, %s3983_s14  ;;  %p2803_p2 = por %p201_p11, %p169_p10 }
  0x46   : > { %p45_p1 = scmp.ge.s32.totalorder %s3985_s21, 2  ;;  %p2807_p3 = por %p207_p0, %p175_p4 }
  0x47   : > { %s3941_s15 = scalar_select %p2803_p2, 1, 0 }
  0x48   : > { %s3943_s9 = scalar_select %p2807_p3, 1, 0 }
  0x49   : > { %3942 = sst [smem:[#allocation19_spill]] %s3941_s15  ;;  %s285_s8 = sand.u32 1, %s2549_s20  }
  0x4a   : > { %3944 = sst [smem:[#allocation20_spill]] %s3943_s9  ;;  %s2069_s11 = sshll.u32 %s2581_s28, 4 }
  0x4b   : > { %s3987_s21 = smov (%p45_p1, %s3985_s21), 0  ;;  %s2068_s2 = sshll.u32 %s285_s8, 7 }
  0x4c   : > { %s103_s12 = ssub.s32 %s2585_s29, %s3987_s21  ;;  %s2070_s27 = sshll.u32 %s2585_s29, 5 }
  0x4d   : > { %p104_p5 = scmp.eq.s32.totalorder %s103_s12, 0  ;;  %s159_s14 = sor.u32 %s158_s13, %s103_s12 }
  0x4e   : > { %p160_p8 = scmp.eq.s32.totalorder %s159_s14, 0  ;;  %s3945_s18 = sadd.s32 1, %s2561_s23 }
  0x4f   : > { %s2821_s5 = scalar_select %p104_p5, %s2561_s23, %s3945_s18  }
  0x50   : > { %s2824_s15 = scalar_select %p160_p8, %s2549_s20, %s162_s6  }
  0x51   : > { %s295_s1 = sadd.s32 %s2070_s27, %s2069_s11  ;;  %s289_s9 = scalar_lea.vmem [#allocation6], %s2068_s2 }
  0x52   : > { %s298_s3 = sshll.u32 %s289_s9, 4  ;;  %s2071_s28 = sshll.u32 %s295_s1, 7  ;;  %s2826_s3 = int_to_ptr.vmem [resolvable:$true] %s298_s3 }
  0x53   : > { %s2831_s26 = scalar_lea.hbm %s3899_s4, %s2071_s28  ;;  %p3946_p10 = scmp.lt.s32.totalorder %s2589_s30, 8 }
  0x54   : > { %s2841_s1 = scalar_lea.sflag [#allocation7], %s285_s8  ;;  %s2417_s2 = scalar_lea.hbm %s2831_s26, 2048 }
  0x55   : > { %p2837_p7 = pnand %p3946_p10, %p2782_p12  ;;  %p2418_p4 = scmp.ne.s32.totalorder %s2831_s26, %s2417_s2 }
  0x56   : > { %s2422_s27 = scalar_lea.hbm %s3899_s4, 8192  ;;  %p2423_p12 = scmp.lt.u32.totalorder %s2831_s26, %s3899_s4 }
  0x57   : > { %p2419_p9 = pneg %p2837_p7  ;;  %p2424_p1 = scmp.lt.u32.totalorder %s2422_s27, %s2417_s2 }
  0x58   : > { %p2426_p8 = scmp.lt.u32.totalorder %s2417_s2, %s2831_s26 }
  0x59   : > { %p2420_p11 = pnand %p2419_p9, %p2418_p4  ;;  %p2425_p5 = por %p2424_p1, %p2423_p12 }
  0x5b   : > { %p2421_p0 = pneg %p2420_p11  ;;  %p2427_p10 = por %p2426_p8, %p2425_p5 }
  0x5d   : > { %p2428_p3 = pnand %p2427_p10, %p2421_p0 }
  0x5f   : > { %2431 = shalt.err (!%p2428_p3)
}
  0x60   : > { %s2432_s14 = scalar_lea.vmem %s2826_s3, 2048  ;;  %s2594_s6 = smov [#allocation6]  }
  0x61   : > { %p2433_p4 = scmp.ne.s32.totalorder %s2826_s3, %s2432_s14  ;;  %s2437_s7 = sshll.u32 %s2594_s6, 4  ;;  %s2438_s7 = int_to_ptr.vmem [resolvable:$false] %s2437_s7 }
  0x62   : > { %s2439_s13 = scalar_lea.vmem %s2438_s7, 4096  ;;  %p2440_p13 = scmp.lt.s32.totalorder %s2826_s3, %s2438_s7 }
  0x63   : > { %p2435_p11 = pnand %p2433_p4, %p2419_p9  ;;  %p2441_p12 = scmp.lt.s32.totalorder %s2439_s13, %s2432_s14 }
  0x65   : > { %p2436_p2 = pneg %p2435_p11  ;;  %p2442_p1 = por %p2441_p12, %p2440_p13 }
  0x67   : > { %p2443_p5 = pnand %p2442_p1, %p2436_p2 }
  0x69   : > { %2446 = shalt.err (!%p2443_p5)
}
  0x6a   : > { %s2595_s9 = smov 128   ;;  %s2596_s8 = smov 8  }
  0x6b   : > { %2179 = dma.hbm_to_vmem [thread:$0]  (!%p2837_p7), %s2831_s26, 2048, %s2826_s3, %s2841_s1, %s2595_s9, %s2595_s9, %s2596_s8  }
  0x6c   : > { %310 = sbr.rel (%p2767_p6) target bundleno = 1288 (0x508), region = 40  ;;  %s312_s11 = sand.u32 (!%p2767_p6), 1, %s2557_s22  }
  0x6d   : > { %s2872_s2 = sshll.u32 (!%p2767_p6), %s312_s11, 7  ;;  %s313_s0 = scalar_lea.sflag (!%p2767_p6), [#allocation4], %s312_s11 }
  0x6e   : > { %p3948_p13 = scmp.ne.s32.totalorder (!%p2767_p6), %s3929_s10, 0 }
  0x73   : > { %2528 = dma.done.wait (%p3948_p13), %s313_s0, 2048  }
  0x74   : > { %2530 = vsyncadd (%p3948_p13), %s313_s0, 4294965248  ;;  %s2880_s18 = sand.u32 1, %s2545_s19   ;;  %p3949_p6 = scmp.ne.s32.totalorder %s3938_s16, 0 }
  0x75   : > { %s2074_s3 = sshll.u32 %s2880_s18, 7  ;;  %s322_s26 = scalar_lea.sflag [#allocation7], %s2880_s18 }
  0x76   : > { %s2886_s17 = scalar_lea.vmem [#allocation6], %s2074_s3 }
  0x77   : > { %2532 = dma.done.wait (%p3949_p6), %s322_s26, 2048  }
  0x78   : > { %2534 = vsyncadd (%p3949_p6), %s322_s26, 4294965248  ;;  %s3950_s10 = sld [smem:[#allocation14_spill]]  ;;  %s3951_s1 = sld [smem:[#allocation13_spill]] }
  0x79   : > { %s2893_s27 = sshll.u32 %s2569_s25, 4  ;;  %s3952_s9 = sld [smem:[#allocation21_spill]] }
  0x7a   : > { %p386_p3 = scmp.lt.s32.totalorder %s2893_s27, 31  ;;  %s3953_s26 = sld [smem:[#allocation24_spill]] }
  0x7c   : > { %s387_s28 = scalar_select %p386_p3, %s2893_s27, 31 }
  0x7e   : > { %p384_p2 = scmp.lt.s32.totalorder %s3950_s10, 1  ;;  %p395_p7 = scmp.lt.s32.totalorder %s3951_s1, 1 }
  0x7f   : > { %p2084_p9 = scmp.ne.s32.totalorder %s3951_s1, 0 }
  0x80   : > { %s3989_s10 = smov (!%p384_p2, %s3950_s10), 1  ;;  %vm467_vm0 = vcmask (!%p2084_p9), 23552   ;;  %v2597_v49 = vmov (!%p2084_p9), 0.0   ;;  %vm516_vm1 = vcmask (!%p2084_p9), 7168  }
  0x81   : > { %s2077_s12 = sshll.u32 %s3989_s10, 5  ;;  %s2079_s7 = sshll.u32 %s3989_s10, 1 }
  0x82   : > { %s389_s14 = sadd.s32 %s2077_s12, %s387_s28 }
  0x83   : > { %s2078_s6 = sshll.u32 %s389_s14, 3 }
  0x84   : > { %s391_s8 = scalar_lea.vmem %s3952_s9, %s2078_s6  ;;  %s2906_s25 = scalar_lea.vmem %s3953_s26, %s2078_s6 }
  0x85   : > { %s396_s24 = scalar_select %p395_p7, %s3951_s1, 1  ;;  %v2909_v0 = vld [vmem:[%s391_s8] sm:$0xff]  ;;  %v2911_v1 = vld [vmem:[%s391_s8 + $0x8] sm:$0xff]  ;;  %v2913_v2 = vld [vmem:[%s391_s8 + $0x10] sm:$0xff] }
  0x86   : > { %v2915_v3 = vld [vmem:[%s391_s8 + $0x18] sm:$0xff]  ;;  %v2917_v4 = vld [vmem:[%s391_s8 + $0x20] sm:$0xff]  ;;  %v2919_v5 = vld [vmem:[%s391_s8 + $0x28] sm:$0xff]  ;;  %s3954_s6 = sld [smem:[#allocation22_spill]]  ;;  %v453_v17 = vmul.f32 (!%p2084_p9), %v2913_v2, %v2913_v2  ;;  %v451_v18 = vmul.f32 (!%p2084_p9), %v2909_v0, %v2909_v0  ;;  %v452_v20 = vmul.f32 (!%p2084_p9), %v2911_v1, %v2911_v1 }
  0x87   : > { %s398_s10 = sadd.s32 %s2079_s7, %s396_s24  ;;  %v2921_v6 = vld [vmem:[%s391_s8 + $0x30] sm:$0xff]  ;;  %v2923_v7 = vld [vmem:[%s391_s8 + $0x38] sm:$0xff]  ;;  %v2925_v8 = vld [vmem:[%s391_s8 + $0x40] sm:$0xff]  ;;  %s2948_s24 = scalar_lea.vmem [#allocation8], %s2074_s3  ;;  %v454_v19 = vmul.f32 (!%p2084_p9), %v2915_v3, %v2915_v3  ;;  %v456_v25 = vmul.f32 (!%p2084_p9), %v2919_v5, %v2919_v5  ;;  %v455_v26 = vmul.f32 (!%p2084_p9), %v2917_v4, %v2917_v4 }
  0x88   : > { %s2080_s28 = sshll.u32 %s398_s10, 2  ;;  %v2927_v9 = vld [vmem:[%s391_s8 + $0x48] sm:$0xff]  ;;  %v2929_v10 = vld [vmem:[%s391_s8 + $0x50] sm:$0xff]  ;;  %v2931_v11 = vld [vmem:[%s391_s8 + $0x58] sm:$0xff]  ;;  %434 = sbr.rel (%p2084_p9) target bundleno = 309 (0x135), region = 52  ;;  %v474_v21 = vsel (!%p2084_p9), %vm467_vm0, %v453_v17, 0.0  ;;  %v458_v29 = vmul.f32 (!%p2084_p9), %v2923_v7, %v2923_v7  ;;  %v457_v30 = vmul.f32 (!%p2084_p9), %v2921_v6, %v2921_v6  ;;  %v459_v34 = vmul.f32 (!%p2084_p9), %v2925_v8, %v2925_v8  ;;  %435 = vst [vmem:[%s2948_s24] sm:$0xff] (!%p2084_p9), %v2597_v49 }
  0x89   : > { %v2936_v12 = vld [vmem:[%s391_s8 + $0x60] sm:$0xff]  ;;  %v2938_v13 = vld [vmem:[%s391_s8 + $0x68] sm:$0xff]  ;;  %v2940_v14 = vld [vmem:[%s391_s8 + $0x70] sm:$0xff]  ;;  %v468_v22 = vsel (!%p2084_p9), %vm467_vm0, %v451_v18, 0.0  ;;  %475 = vadd.xlane.f32.xlu1 (!%p2084_p9), %v474_v21  ;;  %v477_v23 = vsel (!%p2084_p9), %vm467_vm0, %v454_v19, 0.0  ;;  %v471_v24 = vsel (!%p2084_p9), %vm467_vm0, %v452_v20, 0.0  ;;  %v460_v33 = vmul.f32 (!%p2084_p9), %v2927_v9, %v2927_v9 }
  0x8a   : > { %v2942_v15 = vld [vmem:[%s391_s8 + $0x78] sm:$0xff]  ;;  %469 = vadd.xlane.f32.xlu0 (!%p2084_p9), %v468_v22  ;;  %v483_v27 = vsel (!%p2084_p9), %vm467_vm0, %v456_v25, 0.0  ;;  %v480_v28 = vsel (!%p2084_p9), %vm467_vm0, %v455_v26, 0.0  ;;  %v489_v31 = vsel (!%p2084_p9), %vm467_vm0, %v458_v29, 0.0  ;;  %v486_v32 = vsel (!%p2084_p9), %vm467_vm0, %v457_v30, 0.0  ;;  %436 = vst [vmem:[%s2948_s24 + $0x8] sm:$0xff] (!%p2084_p9), %v2597_v49 }
  0x8b   : > { %v495_v35 = vsel (!%p2084_p9), %vm467_vm0, %v460_v33, 0.0  ;;  %v492_v36 = vsel (!%p2084_p9), %vm467_vm0, %v459_v34, 0.0  ;;  %v462_v37 = vmul.f32 (!%p2084_p9), %v2931_v11, %v2931_v11  ;;  %v461_v38 = vmul.f32 (!%p2084_p9), %v2929_v10, %v2929_v10  ;;  %437 = vst [vmem:[%s2948_s24 + $0x10] sm:$0xff] (!%p2084_p9), %v2597_v49  ;;  %438 = vst [vmem:[%s2948_s24 + $0x18] sm:$0xff] (!%p2084_p9), %v2597_v49 }
  0x8c   : > { %s400_s16 = scalar_lea.vmem %s3954_s6, %s2080_s28  ;;  %v464_v41 = vmul.f32 (!%p2084_p9), %v2938_v13, %v2938_v13  ;;  %v463_v42 = vmul.f32 (!%p2084_p9), %v2936_v12, %v2936_v12  ;;  %v466_v45 = vmul.f32 (!%p2084_p9), %v2942_v15, %v2942_v15  ;;  %v465_v46 = vmul.f32 (!%p2084_p9), %v2940_v14, %v2940_v14  ;;  %439 = vst [vmem:[%s2948_s24 + $0x20] sm:$0xff] (!%p2084_p9), %v2597_v49 }
  0x8d   : > { %v2944_v16 = vld [vmem:[%s400_s16] sm:$0x7]  ;;  %478 = vadd.xlane.f32.xlu1 (!%p2084_p9), %v477_v23  ;;  %v501_v39 = vsel (!%p2084_p9), %vm467_vm0, %v462_v37, 0.0  ;;  %v498_v40 = vsel (!%p2084_p9), %vm467_vm0, %v461_v38, 0.0  ;;  %440 = vst [vmem:[%s2948_s24 + $0x28] sm:$0xff] (!%p2084_p9), %v2597_v49  ;;  %441 = vst [vmem:[%s2948_s24 + $0x30] sm:$0xff] (!%p2084_p9), %v2597_v49 }
  0x8e   : > { %472 = vadd.xlane.f32.xlu0 (!%p2084_p9), %v471_v24  ;;  %v507_v43 = vsel (!%p2084_p9), %vm467_vm0, %v464_v41, 0.0  ;;  %v504_v44 = vsel (!%p2084_p9), %vm467_vm0, %v463_v42, 0.0  ;;  %v513_v47 = vsel (!%p2084_p9), %vm467_vm0, %v466_v45, 0.0  ;;  %v510_v48 = vsel (!%p2084_p9), %vm467_vm0, %v465_v46, 0.0  ;;  %442 = vst [vmem:[%s2948_s24 + $0x38] sm:$0xff] (!%p2084_p9), %v2597_v49  ;;  %443 = vst [vmem:[%s2948_s24 + $0x40] sm:$0xff] (!%p2084_p9), %v2597_v49 }
  0x8f   : > { %444 = vst [vmem:[%s2948_s24 + $0x48] sm:$0xff] %v2597_v49  ;;  %445 = vst [vmem:[%s2948_s24 + $0x50] sm:$0xff] %v2597_v49 }
  0x90   : > { %446 = vst [vmem:[%s2948_s24 + $0x58] sm:$0xff] %v2597_v49  ;;  %447 = vst [vmem:[%s2948_s24 + $0x60] sm:$0xff] %v2597_v49 }
  0x91   : > { %484 = vadd.xlane.f32.xlu1 %v483_v27  ;;  %448 = vst [vmem:[%s2948_s24 + $0x68] sm:$0xff] %v2597_v49  ;;  %449 = vst [vmem:[%s2948_s24 + $0x70] sm:$0xff] %v2597_v49 }
  0x92   : > { %481 = vadd.xlane.f32.xlu0 %v480_v28  ;;  %450 = vst [vmem:[%s2948_s24 + $0x78] sm:$0xff] %v2597_v49 }
  0x95   : > { %490 = vadd.xlane.f32.xlu1 %v489_v31 }
  0x96   : > { %487 = vadd.xlane.f32.xlu0 %v486_v32 }
  0x99   : > { %496 = vadd.xlane.f32.xlu1 %v495_v35 }
  0x9a   : > { %493 = vadd.xlane.f32.xlu0 %v492_v36 }
  0x9d   : > { %502 = vadd.xlane.f32.xlu1 %v501_v39 }
  0x9e   : > { %499 = vadd.xlane.f32.xlu0 %v498_v40 }
  0xa1   : > { %508 = vadd.xlane.f32.xlu1 %v507_v43 }
  0xa2   : > { %505 = vadd.xlane.f32.xlu0 %v504_v44 }
  0xa5   : > { %514 = vadd.xlane.f32.xlu1 %v513_v47 }
  0xa6   : > { %511 = vadd.xlane.f32.xlu0 %v510_v48 }
 0x116   : > { %v476_v50 = vpop.xlane.xlu1 %475 }
 0x117   : > { %v470_v51 = vpop.xlane.xlu0 %469  ;;  %519 = vst.msk [vmem:[#allocation2 + $0x10] sm:$0xff] %vm516_vm1, %v476_v50 }
 0x118   : > { %517 = vst.msk [vmem:[#allocation2] sm:$0xff] %vm516_vm1, %v470_v51 }
 0x11a   : > { %v479_v52 = vpop.xlane.xlu1 %478 }
 0x11b   : > { %v473_v53 = vpop.xlane.xlu0 %472  ;;  %520 = vst.msk [vmem:[#allocation2 + $0x18] sm:$0xff] %vm516_vm1, %v479_v52 }
 0x11c   : > { %518 = vst.msk [vmem:[#allocation2 + $0x8] sm:$0xff] %vm516_vm1, %v473_v53 }
 0x11e   : > { %v485_v54 = vpop.xlane.xlu1 %484 }
 0x11f   : > { %v482_v55 = vpop.xlane.xlu0 %481  ;;  %522 = vst.msk [vmem:[#allocation2 + $0x28] sm:$0xff] %vm516_vm1, %v485_v54 }
 0x120   : > { %521 = vst.msk [vmem:[#allocation2 + $0x20] sm:$0xff] %vm516_vm1, %v482_v55 }
 0x122   : > { %v491_v56 = vpop.xlane.xlu1 %490 }
 0x123   : > { %v488_v57 = vpop.xlane.xlu0 %487  ;;  %524 = vst.msk [vmem:[#allocation2 + $0x38] sm:$0xff] %vm516_vm1, %v491_v56 }
 0x124   : > { %523 = vst.msk [vmem:[#allocation2 + $0x30] sm:$0xff] %vm516_vm1, %v488_v57 }
 0x126   : > { %v497_v58 = vpop.xlane.xlu1 %496 }
 0x127   : > { %v494_v59 = vpop.xlane.xlu0 %493  ;;  %526 = vst.msk [vmem:[#allocation2 + $0x48] sm:$0xff] %vm516_vm1, %v497_v58 }
 0x128   : > { %525 = vst.msk [vmem:[#allocation2 + $0x40] sm:$0xff] %vm516_vm1, %v494_v59 }
 0x12a   : > { %v503_v60 = vpop.xlane.xlu1 %502 }
 0x12b   : > { %v500_v61 = vpop.xlane.xlu0 %499  ;;  %528 = vst.msk [vmem:[#allocation2 + $0x58] sm:$0xff] %vm516_vm1, %v503_v60 }
 0x12c   : > { %527 = vst.msk [vmem:[#allocation2 + $0x50] sm:$0xff] %vm516_vm1, %v500_v61 }
 0x12e   : > { %v509_v62 = vpop.xlane.xlu1 %508 }
 0x12f   : > { %v506_v63 = vpop.xlane.xlu0 %505  ;;  %530 = vst.msk [vmem:[#allocation2 + $0x68] sm:$0xff] %vm516_vm1, %v509_v62 }
 0x130   : > { %529 = vst.msk [vmem:[#allocation2 + $0x60] sm:$0xff] %vm516_vm1, %v506_v63 }
 0x132   : > { %v515_v17 = vpop.xlane.xlu1 %514 }
 0x133   : > { %v512_v18 = vpop.xlane.xlu0 %511  ;;  %532 = vst.msk [vmem:[#allocation2 + $0x78] sm:$0xff] %vm516_vm1, %v515_v17 }
 0x134   : > { %531 = vst.msk [vmem:[#allocation2 + $0x70] sm:$0xff] %vm516_vm1, %v512_v18 }
 0x135 PF: > { %v2598_v19 = vmov 1   ;;  %v2599_v20 = vmov 0   ;;  %v2600_v21 = vmov 2   ;;  %s3955_s3 = sld [smem:[#allocation13_spill]]  ;;  %s3956_s9 = scalar_lea.vmem [#allocation3], %s2872_s2  ;;  %v845_v22 = vld [vmem:[#allocation2 + $0x18] sm:$0xff]  ;;  %v533_v47 = vmul.f32 %v2944_v16, %v2944_v16 }
 0x136   : > { %2302 = vset.pattern.permute.xlu0 %v2598_v19  ;;  %2301 = vset.pattern.permute.xlu1 %v2599_v20  ;;  %v853_v24 = vld [vmem:[#allocation2 + $0x58] sm:$0xff]  ;;  %v848_v30 = vld [vmem:[#allocation2 + $0x30] sm:$0xff]  ;;  %v846_v35 = vld [vmem:[#allocation2 + $0x20] sm:$0xff]  ;;  %vm534_vm2 = vcmask 1042432   ;;  %v622_v52 = vlaneseq }
 0x137   : > { %643 = vperm.xlu0 %2302, %v2909_v0   ;;  %584 = vperm.xlu1 %2301, %v2925_v8   ;;  %v849_v40 = vld [vmem:[#allocation2 + $0x38] sm:$0xff]  ;;  %v535_v50 = vsel %vm534_vm2, %v533_v47, 0.0 }
 0x138   : > { %v536_v54 = vrot.slane %v535_v50, 4  ;;  %v623_v56 = vshrl.u32 %v622_v52, 7 }
 0x13a   : > { %v857_v41 = vld [vmem:[#allocation2 + $0x78] sm:$0xff]  ;;  %v537_v58 = vadd.f32 %v536_v54, %v535_v50  ;;  %v624_v60 = vsub.s32 0, %v623_v56  ;;  %v708_v63 = vsub.s32 1, %v623_v56  ;;  %v808_v17 = vsub.s32 2, %v623_v56 }
 0x13b   : > { %679 = vperm.xlu0 %2302, %v2927_v9   ;;  %589 = vperm.xlu1 %2301, %v2927_v9   ;;  %s2085_s1 = sshll.u32 %s3955_s3, 7  ;;  %v856_v31 = vld [vmem:[#allocation2 + $0x70] sm:$0xff]  ;;  %p2095_p0 = scmp.ne.s32.totalorder %s3955_s3, 1 }
 0x13c   : > { %s1059_s7 = sshra.s32 %s2085_s1, 3  ;;  %v538_v62 = vrot.slane %v537_v58, 2  ;;  %s2601_s2 = smov (!%p2095_p0), 64   ;;  %vm1676_vm3 = vcmask (!%p2095_p0), 523264   ;;  %vm1853_vm4 = vcmask (!%p2095_p0), 1048064  }
 0x13d   : > { %s2086_s13 = sshll.u32 %s1059_s7, 2 }
 0x13e   : > { %s3073_s8 = scalar_lea.vmem %s3956_s9, %s2086_s13 [#allocation3] }
 0x13f   : > { %651 = vperm.xlu0 %2302, %v2913_v2   ;;  %2303 = vset.pattern.permute.xlu1 %v2598_v19  ;;  %v2317_v23 = vld [vmem:[%s3073_s8 + $0x10] sm:$0xff]   ;;  %v2318_v25 = vld [vmem:[%s3073_s8 + $0x18] sm:$0xff]   ;;  %v2319_v26 = vld [vmem:[%s3073_s8 + $0x20] sm:$0xff]  }
 0x140   : > { %647 = vperm.xlu1 %2303, %v2911_v1   ;;  %v2320_v27 = vld [vmem:[%s3073_s8 + $0x28] sm:$0xff]   ;;  %v2321_v28 = vld [vmem:[%s3073_s8 + $0x30] sm:$0xff]   ;;  %v2322_v29 = vld [vmem:[%s3073_s8 + $0x38] sm:$0xff]  }
 0x143   : > { %687 = vperm.xlu0 %2302, %v2931_v11  }
 0x144   : > { %675 = vperm.xlu1 %2303, %v2925_v8  }
 0x147   : > { %663 = vperm.xlu0 %2302, %v2919_v5  }
 0x148   : > { %2304 = vset.pattern.permute.xlu1 %v2599_v20 }
 0x149   : > { %554 = vperm.xlu1 %2304, %v2913_v2  }
 0x14b   : > { %671 = vperm.xlu0 %2302, %v2923_v7  }
 0x14d   : > { %594 = vperm.xlu1 %2304, %v2929_v10  }
 0x14f   : > { %2311 = vset.pattern.permute.xlu0 %v2600_v21 }
 0x150   : > { %747 = vperm.xlu0 %2311, %v2911_v1  }
 0x151   : > { %599 = vperm.xlu1 %2304, %v2931_v11  }
 0x154   : > { %751 = vperm.xlu0 %2311, %v2913_v2   ;;  %v843_v2 = vld [vmem:[#allocation2 + $0x8] sm:$0xff] }
 0x155   : > { %2305 = vset.pattern.permute.xlu1 %v2598_v19 }
 0x156   : > { %655 = vperm.xlu1 %2305, %v2915_v3  }
 0x158   : > { %783 = vperm.xlu0 %2311, %v2929_v10  }
 0x15a   : > { %683 = vperm.xlu1 %2305, %v2929_v10   ;;  %v844_v10 = vld [vmem:[#allocation2 + $0x10] sm:$0xff] }
 0x15c   : > { %759 = vperm.xlu0 %2311, %v2917_v4  }
 0x15e   : > { %2306 = vset.pattern.permute.xlu1 %v2600_v21 }
 0x15f   : > { %743 = vperm.xlu1 %2306, %v2909_v0  }
 0x160   : > { %795 = vperm.xlu0 %2311, %v2938_v13  }
 0x163   : > { %775 = vperm.xlu1 %2306, %v2925_v8   ;;  %v850_v8 = vld [vmem:[#allocation2 + $0x40] sm:$0xff] }
 0x164   : > { %771 = vperm.xlu0 %2311, %v2923_v7  }
 0x167   : > { %779 = vperm.xlu1 %2306, %v2927_v9   ;;  %v842_v9 = vld [vmem:[#allocation2] sm:$0xff] }
 0x168   : > { %803 = vperm.xlu0 %2311, %v2942_v15  }
 0x16b   : > { %755 = vperm.xlu1 %2306, %v2915_v3  }
 0x16c   : > { %2313 = vset.pattern.permute.xlu0 %v2599_v20 }
 0x16d   : > { %544 = vperm.xlu0 %2313, %v2909_v0   ;;  %v2315_v0 = vld [vmem:[%s3073_s8] sm:$0xff]  }
 0x16e   : > { %2119 = vmatprep.subr.bf16.mxu0 %v2315_v0  ;;  %2151 = vmatprep.subr.bf16.mxu1 %v2315_v0 }
 0x16f   : > { %787 = vperm.xlu1 %2306, %v2931_v11   ;;  %2120 = vmatpush3.bf16.msra.mxu0 %v2315_v0  ;;  %v2316_v11 = vld [vmem:[%s3073_s8 + $0x8] sm:$0xff]  }
 0x170   : > { %2159 = vmatpush3.bf16.msra.mxu1 %v2315_v0  ;;  %2121 = vmatprep.subr.bf16.mxu0 %v2316_v11  ;;  %v3137_v0 = vrot.slane %v2944_v16, %v808_v17 }
 0x171   : > { %549 = vperm.xlu0 %2313, %v2911_v1   ;;  %v851_v1 = vld [vmem:[#allocation2 + $0x48] sm:$0xff]  ;;  %2152 = vmatprep.subr.bf16.mxu1 %v2316_v11 }
 0x173   : > { %2307 = vset.pattern.permute.xlu1 %v2599_v20  ;;  %2122 = vmatpush3.bf16.msra.mxu0 %v2316_v11 }
 0x174   : > { %865 = vperm.xlu1 %2307, %v843_v2   ;;  %2160 = vmatpush3.bf16.msra.mxu1 %v2316_v11 }
 0x175   : > { %559 = vperm.xlu0 %2313, %v2915_v3   ;;  %v852_v3 = vld [vmem:[#allocation2 + $0x50] sm:$0xff]  ;;  %2123 = vmatprep.subr.bf16.mxu0 %v2317_v23 }
 0x176   : > { %2153 = vmatprep.subr.bf16.mxu1 %v2317_v23 }
 0x177   : > { %2124 = vmatpush3.bf16.msra.mxu0 %v2317_v23 }
 0x178   : > { %900 = vperm.xlu1 %2307, %v850_v8   ;;  %2161 = vmatpush3.bf16.msra.mxu1 %v2317_v23 }
 0x179   : > { %860 = vperm.xlu0 %2313, %v842_v9   ;;  %2125 = vmatprep.subr.bf16.mxu0 %v2318_v25 }
 0x17a   : > { %2154 = vmatprep.subr.bf16.mxu1 %v2318_v25 }
 0x17b   : > { %2126 = vmatpush3.bf16.msra.mxu0 %v2318_v25 }
 0x17c   : > { %870 = vperm.xlu1 %2307, %v844_v10   ;;  %2162 = vmatpush3.bf16.msra.mxu1 %v2318_v25 }
 0x17d   : > { %905 = vperm.xlu0 %2313, %v851_v1   ;;  %2127 = vmatprep.subr.bf16.mxu0 %v2319_v26 }
 0x17e   : > { %2155 = vmatprep.subr.bf16.mxu1 %v2319_v26 }
 0x17f   : > { %2128 = vmatpush3.bf16.msra.mxu0 %v2319_v26 }
 0x180   : > { %910 = vperm.xlu1 %2307, %v852_v3   ;;  %2163 = vmatpush3.bf16.msra.mxu1 %v2319_v26 }
 0x181   : > { %875 = vperm.xlu0 %2313, %v845_v22   ;;  %2129 = vmatprep.subr.bf16.mxu0 %v2320_v27 }
 0x182   : > { %2156 = vmatprep.subr.bf16.mxu1 %v2320_v27 }
 0x183   : > { %2130 = vmatpush3.bf16.msra.mxu0 %v2320_v27 }
 0x184   : > { %564 = vperm.xlu1 %2307, %v2917_v4   ;;  %2164 = vmatpush3.bf16.msra.mxu1 %v2320_v27 }
 0x185   : > { %915 = vperm.xlu0 %2313, %v853_v24   ;;  %2131 = vmatprep.subr.bf16.mxu0 %v2321_v28 }
 0x186   : > { %2157 = vmatprep.subr.bf16.mxu1 %v2321_v28 }
 0x187   : > { %2132 = vmatpush3.bf16.msra.mxu0 %v2321_v28 }
 0x188   : > { %604 = vperm.xlu1 %2307, %v2936_v12   ;;  %2165 = vmatpush3.bf16.msra.mxu1 %v2321_v28 }
 0x189   : > { %569 = vperm.xlu0 %2313, %v2919_v5   ;;  %2133 = vmatprep.subr.bf16.mxu0 %v2322_v29 }
 0x18a   : > { %2158 = vmatprep.subr.bf16.mxu1 %v2322_v29 }
 0x18b   : > { %2134 = vmatpush3.bf16.msra.mxu0 %v2322_v29 }
 0x18c   : > { %2308 = vset.pattern.permute.xlu1 %v2598_v19  ;;  %2166 = vmatpush3.bf16.msra.mxu1 %v2322_v29 }
 0x18d   : > { %609 = vperm.xlu0 %2313, %v2938_v13   ;;  %659 = vperm.xlu1 %2308, %v2917_v4   ;;  %v847_v4 = vld [vmem:[#allocation2 + $0x28] sm:$0xff] }
 0x191   : > { %574 = vperm.xlu0 %2313, %v2921_v6   ;;  %691 = vperm.xlu1 %2308, %v2936_v12  }
 0x195   : > { %619 = vperm.xlu0 %2313, %v2942_v15   ;;  %695 = vperm.xlu1 %2308, %v2938_v13  }
 0x199   : > { %885 = vperm.xlu0 %2313, %v847_v4   ;;  %2309 = vset.pattern.permute.xlu1 %v2599_v20 }
 0x19a   : > { %579 = vperm.xlu1 %2309, %v2923_v7  }
 0x19d   : > { %890 = vperm.xlu0 %2313, %v848_v30  }
 0x19e   : > { %614 = vperm.xlu1 %2309, %v2940_v14  }
 0x1a1   : > { %930 = vperm.xlu0 %2313, %v856_v31  }
 0x1a2   : > { %2310 = vset.pattern.permute.xlu1 %v2598_v19  ;;  %v3129_v19 = vrot.slane %v2944_v16, %v624_v60 }
 0x1a3   : > { %667 = vperm.xlu1 %2310, %v2921_v6  }
 0x1a7   : > { %699 = vperm.xlu1 %2310, %v2940_v14  }
 0x1ab   : > { %703 = vperm.xlu1 %2310, %v2942_v15  }
 0x1af   : > { %2312 = vset.pattern.permute.xlu1 %v2600_v21  ;;  %v3132_v21 = vrot.slane %v2944_v16, %v708_v63 }
 0x1b0   : > { %763 = vperm.xlu1 %2312, %v2919_v5   ;;  %v854_v5 = vld [vmem:[#allocation2 + $0x60] sm:$0xff] }
 0x1b4   : > { %791 = vperm.xlu1 %2312, %v2936_v12  }
 0x1b6   : > { %v644_v7 = vpop.permute.xlu0 %643  ;;  %v585_v13 = vpop.permute.xlu1 %584 }
 0x1b7   : > { %v710_v1 = vmul.f32 %v3132_v21, %v644_v7  ;;  %v634_v3 = vmul.f32 %v3129_v19, %v585_v13 }
 0x1b8   : > { %767 = vperm.xlu1 %2312, %v2921_v6   ;;  %v855_v6 = vld [vmem:[#allocation2 + $0x68] sm:$0xff] }
 0x1ba   : > { %v3104_v32 = vpop.permute.xlu0 %679  ;;  %v3106_v33 = vpop.permute.xlu1 %589 }
 0x1bb   : > { %v719_v29 = vmul.f32 %v3132_v21, %v3104_v32  ;;  %v635_v4 = vmul.f32 %v3129_v19, %v3106_v33 }
 0x1bc   : > { %799 = vperm.xlu1 %2312, %v2940_v14  }
 0x1be   : > { %v652_v34 = vpop.permute.xlu0 %651 }
 0x1bf   : > { %v648_v36 = vpop.permute.xlu1 %647  ;;  %v712_v22 = vmul.f32 %v3132_v21, %v652_v34 }
 0x1c0   : > { %2314 = vset.pattern.permute.xlu1 %v2599_v20  ;;  %v539_v20 = vadd.f32 %v538_v62, %v537_v58  ;;  %v711_v26 = vmul.f32 %v3132_v21, %v648_v36 }
 0x1c1   : > { %880 = vperm.xlu1 %2314, %v846_v35  }
 0x1c2   : > { %v3110_v15 = vpop.permute.xlu0 %687  ;;  %v540_v11 = vrot.slane %v539_v20, 1 }
 0x1c3   : > { %v676_v12 = vpop.permute.xlu1 %675 }
 0x1c4   : > { %v718_v9 = vmul.f32 %v3132_v21, %v676_v12  ;;  %v3154_v36 = vadd.f32 %v540_v11, %v539_v20 }
 0x1c5   : > { %920 = vperm.xlu1 %2314, %v854_v5  }
 0x1c6   : > { %v3112_v37 = vpop.permute.xlu0 %663  ;;  %v734_v30 = vadd.f32 %v718_v9, %v634_v3 }
 0x1c8   : > { %v555_v38 = vpop.permute.xlu1 %554 }
 0x1c9   : > { %925 = vperm.xlu1 %2314, %v855_v6   ;;  %v628_v23 = vmul.f32 %v3129_v19, %v555_v38 }
 0x1ca   : > { %v3114_v39 = vpop.permute.xlu0 %671 }
 0x1cb   : > { %v728_v5 = vadd.f32 %v712_v22, %v628_v23 }
 0x1cc   : > { %v595_v14 = vpop.permute.xlu1 %594 }
 0x1cd   : > { %895 = vperm.xlu1 %2314, %v849_v40   ;;  %v636_v32 = vmul.f32 %v3129_v19, %v595_v14 }
 0x1cf   : > { %v748_v42 = vpop.permute.xlu0 %747 }
 0x1d0   : > { %v3116_v43 = vpop.permute.xlu1 %599  ;;  %v811_v27 = vmul.f32 %v3137_v0, %v748_v42  ;;  %v735_v42 = vadd.f32 %v719_v29, %v635_v4 }
 0x1d1   : > { %935 = vperm.xlu1 %2314, %v857_v41  }
 0x1d3   : > { %v752_v44 = vpop.permute.xlu0 %751 }
 0x1d4   : > { %v812_v31 = vmul.f32 %v3137_v0, %v752_v44 }
 0x1d5   : > { %v656_v45 = vpop.permute.xlu1 %655 }
 0x1d6   : > { %v828_v44 = vadd.f32 %v812_v31, %v728_v5  ;;  %v713_v47 = vmul.f32 %v3132_v21, %v656_v45  ;;  %v721_v45 = vmul.f32 %v3132_v21, %v3110_v15 }
 0x1d7   : > { %v784_v46 = vpop.permute.xlu0 %783 }
 0x1d8   : > { %v956_v17 = vmul.f32 2.0, %v828_v44 }
 0x1d9   : > { %v684_v48 = vpop.permute.xlu1 %683 }
 0x1da   : > { %v720_v7 = vmul.f32 %v3132_v21, %v684_v48  ;;  %v820_v48 = vmul.f32 %v3137_v0, %v784_v46  ;;  %v637_v46 = vmul.f32 %v3129_v19, %v3116_v43 }
 0x1db   : > { %v3120_v49 = vpop.permute.xlu0 %759 }
 0x1dc   : > { %v736_v50 = vadd.f32 %v720_v7, %v636_v32 }
 0x1de   : > { %v744_v51 = vpop.permute.xlu1 %743 }
 0x1df   : > { %v3122_v53 = vpop.permute.xlu0 %795  ;;  %v810_v13 = vmul.f32 %v3137_v0, %v744_v51 }
 0x1e2   : > { %v776_v55 = vpop.permute.xlu1 %775 }
 0x1e3   : > { %v3124_v57 = vpop.permute.xlu0 %771  ;;  %v818_v24 = vmul.f32 %v3137_v0, %v776_v55 }
 0x1e5   : > { %v834_v12 = vadd.f32 %v818_v24, %v734_v30 }
 0x1e6   : > { %v780_v59 = vpop.permute.xlu1 %779 }
 0x1e7   : > { %v3126_v61 = vpop.permute.xlu0 %803  ;;  %v819_v6 = vmul.f32 %v3137_v0, %v780_v59  ;;  %v962_v55 = vmul.f32 2.0, %v834_v12 }
 0x1e9   : > { %v835_v56 = vadd.f32 %v819_v6, %v735_v42 }
 0x1ea   : > { %v756_v18 = vpop.permute.xlu1 %755 }
 0x1eb   : > { %v963_v3 = vmul.f32 2.0, %v835_v56 }
 0x1ec   : > { %v545_v2 = vpop.permute.xlu0 %544 }
 0x1ed   : > { %v626_v8 = vmul.f32 %v3129_v19, %v545_v2  ;;  %v836_v2 = vadd.f32 %v820_v48, %v736_v50 }
 0x1ee   : > { %v788_v10 = vpop.permute.xlu1 %787 }
 0x1ef   : > { %v726_v28 = vadd.f32 %v710_v1, %v626_v8  ;;  %v813_v8 = vmul.f32 %v3137_v0, %v756_v18  ;;  %v821_v22 = vmul.f32 %v3137_v0, %v788_v10 }
 0x1f0   : > { %v550_v25 = vpop.permute.xlu0 %549 }
 0x1f1   : > { %v627_v16 = vmul.f32 %v3129_v19, %v550_v25  ;;  %v826_v40 = vadd.f32 %v810_v13, %v726_v28  ;;  %v737_v28 = vadd.f32 %v721_v45, %v637_v46 }
 0x1f3   : > { %v727_v34 = vadd.f32 %v711_v26, %v627_v16  ;;  %v866_v35 = vpop.permute.xlu1 %865  ;;  %v954_v63 = vmul.f32 2.0, %v826_v40  ;;  %v837_v7 = vadd.f32 %v821_v22, %v737_v28 }
 0x1f4   : > { %v560_v38 = vpop.permute.xlu0 %559  ;;  %v939_v52 = vadd.f32 %v866_v35, %v3154_v36 }
 0x1f5   : > { %v827_v33 = vadd.f32 %v811_v27, %v727_v34  ;;  %v629_v41 = vmul.f32 %v3129_v19, %v560_v38  ;;  %v964_v34 = vmul.f32 2.0, %v836_v2  ;;  %v965_v50 = vmul.f32 2.0, %v837_v7 }
 0x1f7   : > { %v955_v51 = vmul.f32 2.0, %v827_v33  ;;  %v901_v54 = vpop.permute.xlu1 %900  ;;  %v729_v60 = vadd.f32 %v713_v47, %v629_v41 }
 0x1f8   : > { %v946_v58 = vadd.f32 %v901_v54, %v3154_v36  ;;  %v861_v14 = vpop.permute.xlu0 %860 }
 0x1f9   : > { %v971_v59 = vsub.f32 %v939_v52, %v955_v51  ;;  %v938_v62 = vadd.f32 %v861_v14, %v3154_v36  ;;  %v829_v15 = vadd.f32 %v813_v8, %v729_v60 }
 0x1fa   : > { %v978_v20 = vsub.f32 %v946_v58, %v962_v55 }
 0x1fb   : > { %v987_v9 = vmax.f32 %v971_v59, 0.0  ;;  %v970_v1 = vsub.f32 %v938_v62, %v954_v63  ;;  %v871_v11 = vpop.permute.xlu1 %870  ;;  %v957_v38 = vmul.f32 2.0, %v829_v15 }
 0x1fc   : > { %v994_v23 = vmax.f32 %v978_v20, 0.0  ;;  %v940_v24 = vadd.f32 %v871_v11, %v3154_v36  ;;  %v906_v25 = vpop.permute.xlu0 %905 }
 0x1fd   : > { %v1003_v26 = vmul.f32 -1.125, %v987_v9  ;;  %v986_v27 = vmax.f32 %v970_v1, 0.0  ;;  %v947_v43 = vadd.f32 %v906_v25, %v3154_v36 }
 0x1fe   : > { %v1010_v16 = vmul.f32 -1.125, %v994_v23  ;;  %v972_v29 = vsub.f32 %v940_v24, %v956_v17 }
 0x1ff   : > { %v1020_v4 = vmul.f32 1.442695, %v1003_v26  ;;  %v1002_v18 = vmul.f32 -1.125, %v986_v27  ;;  %v979_v30 = vsub.f32 %v947_v43, %v963_v3  ;;  %v911_v31 = vpop.permute.xlu1 %910  ;;  %v717_v43 = vmul.f32 %v3132_v21, %v3114_v39 }
 0x200   : > { %v988_v13 = vmax.f32 %v972_v29, 0.0  ;;  %v948_v10 = vadd.f32 %v911_v31, %v3154_v36  ;;  %v876_v35 = vpop.permute.xlu0 %875  ;;  %v1034_v32 = vmul.f32 1.442695, %v1010_v16  ;;  %v817_v29 = vmul.f32 %v3137_v0, %v3124_v57 }
 0x201   : > { %v1018_v5 = vmul.f32 1.442695, %v1002_v18  ;;  %v995_v12 = vmax.f32 %v979_v30, 0.0  ;;  %v941_v6 = vadd.f32 %v876_v35, %v3154_v36  ;;  %2323 = vpow2.f32 %v1020_v4 }
 0x202   : > { %v1004_v40 = vmul.f32 -1.125, %v988_v13  ;;  %v980_v33 = vsub.f32 %v948_v10, %v964_v34  ;;  %v715_v39 = vmul.f32 %v3132_v21, %v3112_v37 }
 0x203   : > { %2325 = vpow2.f32 %v1018_v5  ;;  %v1011_v41 = vmul.f32 -1.125, %v995_v12  ;;  %v973_v42 = vsub.f32 %v941_v6, %v957_v38  ;;  %v3174_v44 = vpop.permute.xlu1 %564 }
 0x204   : > { %v996_v47 = vmax.f32 %v980_v33, 0.0  ;;  %v916_v48 = vpop.permute.xlu0 %915  ;;  %2327 = vpow2.f32 %v1034_v32  ;;  %v1022_v55 = vmul.f32 1.442695, %v1004_v40 }
 0x205   : > { %v1036_v51 = vmul.f32 1.442695, %v1011_v41  ;;  %v989_v52 = vmax.f32 %v973_v42, 0.0  ;;  %v949_v54 = vadd.f32 %v916_v48, %v3154_v36  ;;  %v630_v42 = vmul.f32 %v3129_v19, %v3174_v44 }
 0x206   : > { %v1012_v56 = vmul.f32 -1.125, %v996_v47 }
 0x207   : > { %2329 = vpow2.f32 %v1036_v51  ;;  %v1005_v58 = vmul.f32 -1.125, %v989_v52  ;;  %v981_v14 = vsub.f32 %v949_v54, %v965_v50  ;;  %v3177_v59 = vpop.permute.xlu1 %604 }
 0x208   : > { %2331 = vpow2.f32 %v1022_v55  ;;  %v1038_v63 = vmul.f32 1.442695, %v1012_v56  ;;  %v570_v31 = vpop.permute.xlu0 %569  ;;  %v814_v56 = vmul.f32 %v3137_v0, %v3120_v49 }
 0x209   : > { %v1024_v60 = vmul.f32 1.442695, %v1005_v58  ;;  %v997_v62 = vmax.f32 %v981_v14, 0.0  ;;  %v631_v5 = vmul.f32 %v3129_v19, %v570_v31 }
 0x20b   : > { %2333 = vpow2.f32 %v1024_v60  ;;  %v1013_v45 = vmul.f32 -1.125, %v997_v62  ;;  %v2324_v46 = vpop.eup %2323  ;;  %v731_v6 = vadd.f32 %v715_v39, %v631_v5 }
 0x20c   : > { %v660_v17 = vpop.permute.xlu1 %659  ;;  %2335 = vpow2.f32 %v1038_v63  ;;  %v610_v13 = vpop.permute.xlu0 %609 }
 0x20d   : > { %v2326_v20 = vpop.eup %2325  ;;  %v1040_v2 = vmul.f32 1.442695, %v1013_v45  ;;  %v714_v33 = vmul.f32 %v3132_v21, %v660_v17  ;;  %v639_v44 = vmul.f32 %v3129_v19, %v610_v13  ;;  %v638_v45 = vmul.f32 %v3129_v19, %v3177_v59 }
 0x20e   : > { %v1050_v8 = vpack.c.bf16 %v2324_v46, %v2326_v20  ;;  %v2328_v9 = vpop.eup %2327  ;;  %v823_v59 = vmul.f32 %v3137_v0, %v3122_v53 }
 0x20f   : > { %2337 = vpow2.f32 %v1040_v2  ;;  %v730_v37 = vadd.f32 %v714_v33, %v630_v42 }
 0x210   : > { %v692_v1 = vpop.permute.xlu1 %691  ;;  %2135 = vmatprep.mubr.bf16.mxu0 %v1050_v8  ;;  %v575_v35 = vpop.permute.xlu0 %574 }
 0x211   : > { %v2330_v11 = vpop.eup %2329  ;;  %v632_v52 = vmul.f32 %v3129_v19, %v575_v35  ;;  %v722_v58 = vmul.f32 %v3132_v21, %v692_v1  ;;  %v830_v46 = vadd.f32 %v814_v56, %v730_v37 }
 0x212   : > { %v1054_v3 = vpack.c.bf16 %v2330_v11, %v2328_v9  ;;  %v2332_v22 = vpop.eup %2331 }
 0x213   : > { %v738_v9 = vadd.f32 %v722_v58, %v638_v45 }
 0x214   : > { %v696_v23 = vpop.permute.xlu1 %695  ;;  %2143 = vmatprep.mubr.bf16.mxu1 %v1054_v3  ;;  %v620_v38 = vpop.permute.xlu0 %619 }
 0x215   : > { %v2334_v24 = vpop.eup %2333  ;;  %v723_v60 = vmul.f32 %v3132_v21, %v696_v23  ;;  %v641_v53 = vmul.f32 %v3129_v19, %v620_v38 }
 0x216   : > { %v1051_v25 = vpack.c.bf16 %v2334_v24, %v2332_v22  ;;  %v2336_v26 = vpop.eup %2335  ;;  %v958_v24 = vmul.f32 2.0, %v830_v46 }
 0x217   : > { %v739_v11 = vadd.f32 %v723_v60, %v639_v44 }
 0x218   : > { %2136 = vmatmul.mubr.bf16.vlgmr.msra.gmra.mrb[0].mxu0 %v1051_v25  ;;  %v886_v47 = vpop.permute.xlu0 %885 }
 0x219   : > { %v2338_v15 = vpop.eup %2337  ;;  %v580_v27 = vpop.permute.xlu1 %579  ;;  %v943_v50 = vadd.f32 %v886_v47, %v3154_v36  ;;  %v825_v47 = vmul.f32 %v3137_v0, %v3126_v61 }
 0x21a   : > { %v633_v28 = vmul.f32 %v3129_v19, %v580_v27  ;;  %v1055_v16 = vpack.c.bf16 %v2338_v15, %v2336_v26 }
 0x21c   : > { %v733_v4 = vadd.f32 %v717_v43, %v633_v28  ;;  %2144 = vmatmul.mubr.bf16.vlgmr.msra.gmra.mrb[0].mxu1 %v1055_v16  ;;  %v891_v1 = vpop.permute.xlu0 %890  ;;  %v839_v28 = vadd.f32 %v823_v59, %v739_v11 }
 0x21d   : > { %v615_v18 = vpop.permute.xlu1 %614  ;;  %v944_v16 = vadd.f32 %v891_v1, %v3154_v36 }
 0x21e   : > { %v3184_v30 = vadd.f32 %v817_v29, %v733_v4  ;;  %v640_v20 = vmul.f32 %v3129_v19, %v615_v18 }
 0x220   : > { %v931_v4 = vpop.permute.xlu0 %930  ;;  %v961_v37 = vmul.f32 2.0, %v3184_v30 }
 0x222   : > { %v668_v7 = vpop.permute.xlu1 %667 }
 0x223   : > { %v716_v51 = vmul.f32 %v3132_v21, %v668_v7 }
 0x225   : > { %v732_v62 = vadd.f32 %v716_v51, %v632_v52 }
 0x226   : > { %v700_v34 = vpop.permute.xlu1 %699 }
 0x227   : > { %v724_v63 = vmul.f32 %v3132_v21, %v700_v34 }
 0x229   : > { %v740_v3 = vadd.f32 %v724_v63, %v640_v20 }
 0x22a   : > { %v704_v10 = vpop.permute.xlu1 %703 }
 0x22b   : > { %v725_v18 = vmul.f32 %v3132_v21, %v704_v10 }
 0x22f   : > { %v764_v12 = vpop.permute.xlu1 %763 }
 0x230   : > { %v815_v57 = vmul.f32 %v3137_v0, %v764_v12 }
 0x232   : > { %v831_v32 = vadd.f32 %v815_v57, %v731_v6  ;;  %v952_v6 = vadd.f32 %v931_v4, %v3154_v36  ;;  %v967_v57 = vmul.f32 2.0, %v839_v28 }
 0x233   : > { %v792_v40 = vpop.permute.xlu1 %791 }
 0x234   : > { %v959_v41 = vmul.f32 2.0, %v831_v32  ;;  %v822_v17 = vmul.f32 %v3137_v0, %v792_v40  ;;  %v741_v40 = vadd.f32 %v725_v18, %v641_v53  ;;  %v1080_v18 = vld [vmem:[%s2948_s24 + $0x8] sm:$0xff] }
 0x236   : > { %v975_v54 = vsub.f32 %v943_v50, %v959_v41  ;;  %v838_v23 = vadd.f32 %v822_v17, %v738_v9  ;;  %v841_v50 = vadd.f32 %v825_v47, %v741_v40  ;;  %v1083_v47 = vld [vmem:[%s2948_s24 + $0x20] sm:$0xff] }
 0x237   : > { %v768_v48 = vpop.permute.xlu1 %767 }
 0x238   : > { %v816_v55 = vmul.f32 %v3137_v0, %v768_v48  ;;  %v991_v2 = vmax.f32 %v975_v54, 0.0  ;;  %v966_v31 = vmul.f32 2.0, %v838_v23  ;;  %v969_v63 = vmul.f32 2.0, %v841_v50 }
 0x23a   : > { %v832_v49 = vadd.f32 %v816_v55, %v732_v62  ;;  %v1007_v26 = vmul.f32 -1.125, %v991_v2 }
 0x23b   : > { %v800_v14 = vpop.permute.xlu1 %799 }
 0x23c   : > { %v824_v8 = vmul.f32 %v3137_v0, %v800_v14  ;;  %v960_v15 = vmul.f32 2.0, %v832_v49  ;;  %v1028_v34 = vmul.f32 1.442695, %v1007_v26 }
 0x23e   : > { %v840_v27 = vadd.f32 %v824_v8, %v740_v3  ;;  %v976_v35 = vsub.f32 %v944_v16, %v960_v15  ;;  %2339 = vpow2.f32 %v1028_v34  ;;  %v1082_v16 = vld [vmem:[%s2948_s24 + $0x18] sm:$0xff] }
 0x240   : > { %v881_v22 = vpop.permute.xlu1 %880  ;;  %v968_v5 = vmul.f32 2.0, %v840_v27  ;;  %v992_v10 = vmax.f32 %v976_v35, 0.0  ;;  %v1081_v27 = vld [vmem:[%s2948_s24 + $0x10] sm:$0xff] }
 0x241   : > { %v942_v25 = vadd.f32 %v881_v22, %v3154_v36 }
 0x242   : > { %v984_v42 = vsub.f32 %v952_v6, %v968_v5  ;;  %v1008_v54 = vmul.f32 -1.125, %v992_v10  ;;  %v1087_v5 = vld [vmem:[%s2948_s24 + $0x40] sm:$0xff] }
 0x243   : > { %v974_v43 = vsub.f32 %v942_v25, %v958_v24 }
 0x244   : > { %v921_v29 = vpop.permute.xlu1 %920  ;;  %v1000_v55 = vmax.f32 %v984_v42, 0.0  ;;  %v1030_v0 = vmul.f32 1.442695, %v1008_v54  ;;  %v1085_v42 = vld [vmem:[%s2948_s24 + $0x30] sm:$0xff] }
 0x245   : > { %v990_v7 = vmax.f32 %v974_v43, 0.0  ;;  %v950_v13 = vadd.f32 %v921_v29, %v3154_v36  ;;  %v1079_v43 = vld [vmem:[%s2948_s24] sm:$0xff]  ;;  %v1093_v54 = vld [vmem:[%s2948_s24 + $0x70] sm:$0xff] }
 0x246   : > { %v1016_v45 = vmul.f32 -1.125, %v1000_v55 }
 0x247   : > { %v1006_v39 = vmul.f32 -1.125, %v990_v7  ;;  %v982_v12 = vsub.f32 %v950_v13, %v966_v31  ;;  %v1089_v13 = vld [vmem:[%s2948_s24 + $0x50] sm:$0xff] }
 0x248   : > { %v926_v32 = vpop.permute.xlu1 %925  ;;  %v2340_v30 = vpop.eup %2339  ;;  %v1046_v8 = vmul.f32 1.442695, %v1016_v45 }
 0x249   : > { %v1026_v33 = vmul.f32 1.442695, %v1006_v39  ;;  %v998_v41 = vmax.f32 %v982_v12, 0.0  ;;  %v951_v21 = vadd.f32 %v926_v32, %v3154_v36  ;;  %v1090_v12 = vld [vmem:[%s2948_s24 + $0x58] sm:$0xff]  ;;  %v1088_v32 = vld [vmem:[%s2948_s24 + $0x48] sm:$0xff] }
 0x24b   : > { %2341 = vpow2.f32 %v1026_v33  ;;  %v1014_v48 = vmul.f32 -1.125, %v998_v41  ;;  %v983_v19 = vsub.f32 %v951_v21, %v967_v57 }
 0x24c   : > { %v896_v38 = vpop.permute.xlu1 %895 }
 0x24d   : > { %v999_v51 = vmax.f32 %v983_v19, 0.0  ;;  %v945_v52 = vadd.f32 %v896_v38, %v3154_v36  ;;  %v1042_v56 = vmul.f32 1.442695, %v1014_v48  ;;  %v1086_v19 = vld [vmem:[%s2948_s24 + $0x38] sm:$0xff] }
 0x24f   : > { %v1015_v58 = vmul.f32 -1.125, %v999_v51  ;;  %v977_v14 = vsub.f32 %v945_v52, %v961_v37  ;;  %2343 = vpow2.f32 %v1042_v56  ;;  %v1084_v51 = vld [vmem:[%s2948_s24 + $0x28] sm:$0xff] }
 0x250   : > { %v936_v44 = vpop.permute.xlu1 %935 }
 0x251   : > { %v1044_v60 = vmul.f32 1.442695, %v1015_v58  ;;  %v993_v62 = vmax.f32 %v977_v14, 0.0  ;;  %v953_v61 = vadd.f32 %v936_v44, %v3154_v36  ;;  %v1091_v58 = vld [vmem:[%s2948_s24 + $0x60] sm:$0xff] }
 0x253   : > { %2345 = vpow2.f32 %v1044_v60  ;;  %v1009_v46 = vmul.f32 -1.125, %v993_v62  ;;  %v985_v17 = vsub.f32 %v953_v61, %v969_v63  ;;  %v1094_v60 = vld [vmem:[%s2948_s24 + $0x78] sm:$0xff]  ;;  %v1092_v61 = vld [vmem:[%s2948_s24 + $0x68] sm:$0xff] }
 0x254   : > { %2347 = vpow2.f32 %v1030_v0 }
 0x255   : > { %v2342_v20 = vpop.eup %2341  ;;  %v1032_v2 = vmul.f32 1.442695, %v1009_v46  ;;  %v1001_v49 = vmax.f32 %v985_v17, 0.0 }
 0x256   : > { %v1052_v9 = vpack.c.bf16 %v2340_v30, %v2342_v20  ;;  %v3256_v20 = vld [vmem:[%s2906_s25] sm:$0xff] (!%p2095_p0) }
 0x257   : > { %2349 = vpow2.f32 %v1032_v2  ;;  %v1017_v1 = vmul.f32 -1.125, %v1001_v49  ;;  %v3259_v2 = vld [vmem:[%s2906_s25 + $0x10] sm:$0xff] (!%p2095_p0)  ;;  %1420 = vrot.lane.b32.xlu0 (!%p2095_p0), %v3256_v20, %s2601_s2  ;;  %v3266_v49 = vld [vmem:[%s2906_s25 + $0x8] sm:$0xff] (!%p2095_p0) }
 0x258   : > { %2139 = vmatprep.mubr.bf16.mxu0 %v1052_v9  ;;  %2351 = vpow2.f32 %v1046_v8  ;;  %1424 = vrot.lane.b32.xlu1 (!%p2095_p0), %v3259_v2, %s2601_s2  ;;  %v3269_v8 = vld [vmem:[%s2906_s25 + $0x18] sm:$0xff] (!%p2095_p0)  ;;  %v3276_v9 = vld [vmem:[%s2906_s25 + $0x20] sm:$0xff] (!%p2095_p0) }
 0x259   : > { %v1048_v11 = vmul.f32 1.442695, %v1017_v1  ;;  %v2344_v36 = vpop.eup %2343  ;;  %v3279_v1 = vld [vmem:[%s2906_s25 + $0x28] sm:$0xff] (!%p2095_p0) }
 0x25b   : > { %2353 = vpow2.f32 %v1048_v11  ;;  %1422 = vrot.lane.b32.xlu0 (!%p2095_p0), %v3266_v49, %s2601_s2  ;;  %v3286_v11 = vld [vmem:[%s2906_s25 + $0x30] sm:$0xff] (!%p2095_p0) }
 0x25c   : > { %1426 = vrot.lane.b32.xlu1 (!%p2095_p0), %v3269_v8, %s2601_s2 }
 0x25d   : > { %v2346_v3 = vpop.eup %2345 }
 0x25e   : > { %v1056_v22 = vpack.c.bf16 %v2346_v3, %v2344_v36  ;;  %v2348_v23 = vpop.eup %2347  ;;  %v3289_v36 = vld [vmem:[%s2906_s25 + $0x38] sm:$0xff] (!%p2095_p0)  ;;  %v3296_v3 = vld [vmem:[%s2906_s25 + $0x40] sm:$0xff] (!%p2095_p0) }
 0x25f   : > { %1428 = vrot.lane.b32.xlu0 (!%p2095_p0), %v3276_v9, %s2601_s2 }
 0x260   : > { %2147 = vmatprep.mubr.bf16.mxu1 %v1056_v22  ;;  %1430 = vrot.lane.b32.xlu1 (!%p2095_p0), %v3279_v1, %s2601_s2  ;;  %v3299_v22 = vld [vmem:[%s2906_s25 + $0x48] sm:$0xff] (!%p2095_p0) }
 0x261   : > { %v2350_v24 = vpop.eup %2349 }
 0x262   : > { %v1053_v25 = vpack.c.bf16 %v2350_v24, %v2348_v23  ;;  %v2352_v59 = vpop.eup %2351  ;;  %v3306_v23 = vld [vmem:[%s2906_s25 + $0x50] sm:$0xff] (!%p2095_p0)  ;;  %v3309_v24 = vld [vmem:[%s2906_s25 + $0x58] sm:$0xff] (!%p2095_p0) }
 0x263   : > { %1432 = vrot.lane.b32.xlu0 (!%p2095_p0), %v3286_v11, %s2601_s2 }
 0x264   : > { %2140 = vmatmul.mubr.bf16.gmra.mrb[4].mxu0 %v1053_v25  ;;  %1434 = vrot.lane.b32.xlu1 (!%p2095_p0), %v3289_v36, %s2601_s2  ;;  %v3316_v25 = vld [vmem:[%s2906_s25 + $0x60] sm:$0xff] (!%p2095_p0) }
 0x265   : > { %v2354_v26 = vpop.eup %2353 }
 0x266   : > { %v1057_v15 = vpack.c.bf16 %v2354_v26, %v2352_v59  ;;  %v3319_v59 = vld [vmem:[%s2906_s25 + $0x68] sm:$0xff] (!%p2095_p0)  ;;  %v3326_v26 = vld [vmem:[%s2906_s25 + $0x70] sm:$0xff] (!%p2095_p0) }
 0x267   : > { %1436 = vrot.lane.b32.xlu0 (!%p2095_p0), %v3296_v3, %s2601_s2 }
 0x268   : > { %2148 = vmatmul.mubr.bf16.gmra.mrb[4].mxu1 %v1057_v15  ;;  %1438 = vrot.lane.b32.xlu1 (!%p2095_p0), %v3299_v22, %s2601_s2  ;;  %v3329_v15 = vld [vmem:[%s2906_s25 + $0x78] sm:$0xff] (!%p2095_p0) }
 0x26b   : > { %1440 = vrot.lane.b32.xlu0 (!%p2095_p0), %v3306_v23, %s2601_s2 }
 0x26c   : > { %1442 = vrot.lane.b32.xlu1 (!%p2095_p0), %v3309_v24, %s2601_s2 }
 0x26f   : > { %1444 = vrot.lane.b32.xlu0 (!%p2095_p0), %v3316_v25, %s2601_s2 }
 0x270   : > { %1446 = vrot.lane.b32.xlu1 (!%p2095_p0), %v3319_v59, %s2601_s2 }
 0x273   : > { %1448 = vrot.lane.b32.xlu0 (!%p2095_p0), %v3326_v26, %s2601_s2 }
 0x274   : > { %1450 = vrot.lane.b32.xlu1 (!%p2095_p0), %v3329_v15, %s2601_s2 }
 0x2eb   : > { %v2137_v28 = vpop.f32.mrb[0].mxu0 }
 0x2ec   : > { %v1242_v29 = vadd.f32 %v2137_v28, %v1081_v27  ;;  %v1177_v4 = vpop.f32.mrb[1].mxu0  ;;  %v1421_v28 = vpop.permute.xlu0 (!%p2095_p0), %1420 }
 0x2ed   : > { %v1240_v31 = vadd.f32 %v1177_v4, %v1079_v43  ;;  %v2138_v7 = vpop.f32.mrb[2].mxu0 }
 0x2ee   : > { %1258 = vst [vmem:[%s2948_s24 + $0x10] sm:$0xff] %v1242_v29  ;;  %v1243_v34 = vadd.f32 %v2138_v7, %v1082_v16  ;;  %v1180_v35 = vpop.f32.mrb[3].mxu0  ;;  %v1425_v16 = vpop.permute.xlu1 (!%p2095_p0), %1424 }
 0x2ef   : > { %1256 = vst [vmem:[%s2948_s24] sm:$0xff] %v1240_v31  ;;  %v1241_v53 = vadd.f32 %v1180_v35, %v1080_v18  ;;  %v2145_v39 = vpop.f32.mrb[0].mxu1 }
 0x2f0   : > { %1259 = vst [vmem:[%s2948_s24 + $0x18] sm:$0xff] %v1243_v34  ;;  %v1250_v6 = vadd.f32 %v2145_v39, %v1089_v13  ;;  %v1209_v57 = vpop.f32.mrb[1].mxu1  ;;  %v1423_v7 = vpop.permute.xlu0 (!%p2095_p0), %1422 }
 0x2f1   : > { %1257 = vst [vmem:[%s2948_s24 + $0x8] sm:$0xff] %v1241_v53  ;;  %v1248_v40 = vadd.f32 %v1209_v57, %v1087_v5  ;;  %v2146_v33 = vpop.f32.mrb[2].mxu1 }
 0x2f2   : > { %1266 = vst [vmem:[%s2948_s24 + $0x50] sm:$0xff] %v1250_v6  ;;  %v1251_v41 = vadd.f32 %v2146_v33, %v1090_v12  ;;  %v1212_v21 = vpop.f32.mrb[3].mxu1  ;;  %v1427_v13 = vpop.permute.xlu1 (!%p2095_p0), %1426 }
 0x2f3   : > { %1264 = vst [vmem:[%s2948_s24 + $0x40] sm:$0xff] %v1248_v40  ;;  %v1249_v10 = vadd.f32 %v1212_v21, %v1088_v32 }
 0x2f4   : > { %1267 = vst [vmem:[%s2948_s24 + $0x58] sm:$0xff] %v1251_v41  ;;  %v1429_v39 = vpop.permute.xlu0 (!%p2095_p0), %1428 }
 0x2f5   : > { %1265 = vst [vmem:[%s2948_s24 + $0x48] sm:$0xff] %v1249_v10  ;;  %v3337_v43 = vld [vmem:[%s2948_s24 + $0x10] sm:$0xff] (!%p2095_p0) }
 0x2f6   : > { %v1276_v27 = vld [vmem:[%s2948_s24] sm:$0xff] (!%p2095_p0)  ;;  %v3345_v18 = vmul.f32 (!%p2095_p0), %v1425_v16, %v3337_v43  ;;  %v1431_v12 = vpop.permute.xlu1 (!%p2095_p0), %1430  ;;  %v3421_v16 = vmul.f32 (!%p2095_p0), %v3259_v2, %v3337_v43 }
 0x2f7   : > { %v3339_v29 = vmul.f32 (!%p2095_p0), %v1421_v28, %v1276_v27  ;;  %v1279_v31 = vld [vmem:[%s2948_s24 + $0x18] sm:$0xff] (!%p2095_p0) }
 0x2f8   : > { %v1277_v4 = vld [vmem:[%s2948_s24 + $0x8] sm:$0xff] (!%p2095_p0)  ;;  %v3355_v5 = vmul.f32 (!%p2095_p0), %v1427_v13, %v1279_v31  ;;  %v1433_v33 = vpop.permute.xlu0 (!%p2095_p0), %1432 }
 0x2f9   : > { %1500 = vrot.lane.b32.xlu0 (!%p2095_p0), %v3339_v29, %s2601_s2  ;;  %v3348_v34 = vmul.f32 (!%p2095_p0), %v1423_v7, %v1277_v4  ;;  %v3424_v7 = vmul.f32 (!%p2095_p0), %v3266_v49, %v1277_v4 }
 0x2fa   : > { %v1435_v41 = vpop.permute.xlu1 (!%p2095_p0), %1434  ;;  %v1284_v10 = vld [vmem:[%s2948_s24 + $0x40] sm:$0xff] (!%p2095_p0) }
 0x2fb   : > { %1502 = vrot.lane.b32.xlu1 (!%p2095_p0), %v3348_v34, %s2601_s2 }
 0x2fd   : > { %1504 = vrot.lane.b32.xlu0 (!%p2095_p0), %v3345_v18, %s2601_s2 }
 0x2ff   : > { %1506 = vrot.lane.b32.xlu1 (!%p2095_p0), %v3355_v5, %s2601_s2 }
 0x337   : > { %v2141_v48 = vpop.f32.mrb[4].mxu0 }
 0x338   : > { %v1246_v38 = vadd.f32 %v2141_v48, %v1085_v42  ;;  %v1193_v50 = vpop.f32.mrb[5].mxu0  ;;  %v1437_v48 = vpop.permute.xlu0 (!%p2095_p0), %1436 }
 0x339   : > { %v1244_v37 = vadd.f32 %v1193_v50, %v1083_v47  ;;  %v2142_v52 = vpop.f32.mrb[6].mxu0  ;;  %v1285_v47 = vld [vmem:[%s2948_s24 + $0x48] sm:$0xff] (!%p2095_p0)  ;;  %v1286_v50 = vld [vmem:[%s2948_s24 + $0x50] sm:$0xff] (!%p2095_p0) }
 0x33a   : > { %1262 = vst [vmem:[%s2948_s24 + $0x30] sm:$0xff] %v1246_v38  ;;  %v1247_v55 = vadd.f32 %v2142_v52, %v1086_v19  ;;  %v1196_v56 = vpop.f32.mrb[7].mxu0  ;;  %v1439_v19 = vpop.permute.xlu1 (!%p2095_p0), %1438  ;;  %v3378_v38 = vmul.f32 (!%p2095_p0), %v1437_v48, %v1284_v10 }
 0x33b   : > { %1260 = vst [vmem:[%s2948_s24 + $0x20] sm:$0xff] %v1244_v37  ;;  %v1245_v14 = vadd.f32 %v1196_v56, %v1084_v51  ;;  %v2149_v44 = vpop.f32.mrb[4].mxu1  ;;  %1275 = sbr.rel (%p2095_p0) target bundleno = 1257 (0x4e9), region = 56  ;;  %v3385_v51 = vmul.f32 (!%p2095_p0), %v1439_v19, %v1285_v47  ;;  %v1287_v37 = vld [vmem:[%s2948_s24 + $0x58] sm:$0xff] (!%p2095_p0) }
 0x33c   : > { %1263 = vst [vmem:[%s2948_s24 + $0x38] sm:$0xff] %v1247_v55  ;;  %v1254_v62 = vadd.f32 %v2149_v44, %v1093_v54  ;;  %v1225_v63 = vpop.f32.mrb[5].mxu1  ;;  %v1441_v52 = vpop.permute.xlu0 (!%p2095_p0), %1440 }
 0x33d   : > { %1261 = vst [vmem:[%s2948_s24 + $0x28] sm:$0xff] %v1245_v14  ;;  %v1252_v0 = vadd.f32 %v1225_v63, %v1091_v58  ;;  %v2150_v45 = vpop.f32.mrb[6].mxu1  ;;  %v3388_v55 = vmul.f32 (!%p2095_p0), %v1441_v52, %v1286_v50 }
 0x33e   : > { %1270 = vst [vmem:[%s2948_s24 + $0x70] sm:$0xff] %v1254_v62  ;;  %v1255_v46 = vadd.f32 %v2150_v45, %v1094_v60  ;;  %v1228_v17 = vpop.f32.mrb[7].mxu1  ;;  %v1443_v54 = vpop.permute.xlu1 (!%p2095_p0), %1442 }
 0x33f   : > { %1268 = vst [vmem:[%s2948_s24 + $0x60] sm:$0xff] %v1252_v0  ;;  %v1253_v30 = vadd.f32 %v1228_v17, %v1092_v61  ;;  %v3395_v58 = vmul.f32 (!%p2095_p0), %v1443_v54, %v1287_v37 }
 0x340   : > { %1271 = vst [vmem:[%s2948_s24 + $0x78] sm:$0xff] %v1255_v46  ;;  %v1445_v44 = vpop.permute.xlu0 (!%p2095_p0), %1444 }
 0x341   : > { %1269 = vst [vmem:[%s2948_s24 + $0x68] sm:$0xff] %v1253_v30  ;;  %v1282_v57 = vld [vmem:[%s2948_s24 + $0x30] sm:$0xff] (!%p2095_p0)  ;;  %v3411_v30 = vmul.f32 (!%p2095_p0), %v3256_v20, %v1276_v27  ;;  %v3431_v20 = vmul.f32 (!%p2095_p0), %v3269_v8, %v1279_v31 }
 0x342   : > { %v1280_v35 = vld [vmem:[%s2948_s24 + $0x20] sm:$0xff]  ;;  %v3368_v21 = vmul.f32 %v1433_v33, %v1282_v57  ;;  %v1447_v60 = vpop.permute.xlu1 %1446  ;;  %v3444_v49 = vmul.f32 %v3286_v11, %v1282_v57  ;;  %v3464_v11 = vmul.f32 %v3306_v23, %v1286_v50 }
 0x343   : > { %v3358_v6 = vmul.f32 %v1429_v39, %v1280_v35  ;;  %v1283_v40 = vld [vmem:[%s2948_s24 + $0x38] sm:$0xff]  ;;  %v3434_v27 = vmul.f32 %v3276_v9, %v1280_v35  ;;  %v3454_v9 = vmul.f32 %v3296_v3, %v1284_v10 }
 0x344   : > { %v1281_v53 = vld [vmem:[%s2948_s24 + $0x28] sm:$0xff]  ;;  %v3375_v42 = vmul.f32 %v1435_v41, %v1283_v40  ;;  %v1449_v45 = vpop.permute.xlu0 %1448  ;;  %v3451_v8 = vmul.f32 %v3289_v36, %v1283_v40  ;;  %v3471_v36 = vmul.f32 %v3309_v24, %v1287_v37 }
 0x345   : > { %1508 = vrot.lane.b32.xlu0 %v3358_v6, %s2601_s2  ;;  %v3365_v32 = vmul.f32 %v1431_v12, %v1281_v53  ;;  %v1290_v63 = vld [vmem:[%s2948_s24 + $0x70] sm:$0xff]  ;;  %v3441_v2 = vmul.f32 %v3279_v1, %v1281_v53  ;;  %v3461_v1 = vmul.f32 %v3299_v22, %v1285_v47 }
 0x346   : > { %v1288_v56 = vld [vmem:[%s2948_s24 + $0x60] sm:$0xff]  ;;  %v1451_v46 = vpop.permute.xlu1 %1450  ;;  %v3408_v17 = vmul.f32 %v1449_v45, %v1290_v63  ;;  %v3484_v23 = vmul.f32 %v3326_v26, %v1290_v63 }
 0x347   : > { %1510 = vrot.lane.b32.xlu1 %v3365_v32, %s2601_s2  ;;  %v3398_v62 = vmul.f32 %v1445_v44, %v1288_v56  ;;  %v1291_v0 = vld [vmem:[%s2948_s24 + $0x78] sm:$0xff]  ;;  %v3474_v3 = vmul.f32 %v3316_v25, %v1288_v56 }
 0x348   : > { %v1289_v14 = vld [vmem:[%s2948_s24 + $0x68] sm:$0xff]  ;;  %v3417_v28 = vmul.f32 %v1451_v46, %v1291_v0  ;;  %v3491_v24 = vmul.f32 %v3329_v15, %v1291_v0 }
 0x349   : > { %1512 = vrot.lane.b32.xlu0 %v3368_v21, %s2601_s2  ;;  %v3405_v61 = vmul.f32 %v1447_v60, %v1289_v14  ;;  %v3481_v22 = vmul.f32 %v3319_v59, %v1289_v14 }
 0x34b   : > { %1514 = vrot.lane.b32.xlu1 %v3375_v42, %s2601_s2 }
 0x34d   : > { %1516 = vrot.lane.b32.xlu0 %v3378_v38, %s2601_s2 }
 0x34f   : > { %1518 = vrot.lane.b32.xlu1 %v3385_v51, %s2601_s2 }
 0x351   : > { %1520 = vrot.lane.b32.xlu0 %v3388_v55, %s2601_s2 }
 0x353   : > { %1522 = vrot.lane.b32.xlu1 %v3395_v58, %s2601_s2 }
 0x355   : > { %1524 = vrot.lane.b32.xlu0 %v3398_v62, %s2601_s2 }
 0x357   : > { %1526 = vrot.lane.b32.xlu1 %v3405_v61, %s2601_s2 }
 0x359   : > { %1528 = vrot.lane.b32.xlu0 %v3408_v17, %s2601_s2 }
 0x35b   : > { %1530 = vrot.lane.b32.xlu1 %v3417_v28, %s2601_s2 }
 0x35d   : > { %1340 = vrot.lane.b32.xlu0 %v3411_v30, %s2601_s2 }
 0x35f   : > { %1342 = vrot.lane.b32.xlu1 %v3424_v7, %s2601_s2 }
 0x361   : > { %1344 = vrot.lane.b32.xlu0 %v3421_v16, %s2601_s2 }
 0x363   : > { %1346 = vrot.lane.b32.xlu1 %v3431_v20, %s2601_s2 }
 0x365   : > { %1348 = vrot.lane.b32.xlu0 %v3434_v27, %s2601_s2 }
 0x367   : > { %1350 = vrot.lane.b32.xlu1 %v3441_v2, %s2601_s2 }
 0x369   : > { %1352 = vrot.lane.b32.xlu0 %v3444_v49, %s2601_s2 }
 0x36b   : > { %1354 = vrot.lane.b32.xlu1 %v3451_v8, %s2601_s2  ;;  %v1501_v25 = vpop.permute.xlu0 %1500 }
 0x36c   : > { %v3500_v59 = vsub.f32 %v3339_v29, %v1501_v25 }
 0x36d   : > { %1356 = vrot.lane.b32.xlu0 %v3454_v9, %s2601_s2  ;;  %v1503_v43 = vpop.permute.xlu1 %1502 }
 0x36e   : > { %v1580_v26 = vmul.f32 %v3500_v59, %v3500_v59  ;;  %v3505_v15 = vsub.f32 %v3348_v34, %v1503_v43 }
 0x36f   : > { %1358 = vrot.lane.b32.xlu1 %v3461_v1, %s2601_s2  ;;  %v1505_v4 = vpop.permute.xlu0 %1504 }
 0x370   : > { %v3508_v31 = vsub.f32 %v3345_v18, %v1505_v4  ;;  %v1581_v13 = vmul.f32 %v3505_v15, %v3505_v15 }
 0x371   : > { %1360 = vrot.lane.b32.xlu0 %v3464_v11, %s2601_s2  ;;  %v1507_v35 = vpop.permute.xlu1 %1506 }
 0x372   : > { %v1582_v29 = vmul.f32 %v3508_v31, %v3508_v31  ;;  %v3516_v39 = vsub.f32 %v3355_v5, %v1507_v35 }
 0x373   : > { %1362 = vrot.lane.b32.xlu1 %v3471_v36, %s2601_s2 }
 0x374   : > { %v1583_v18 = vmul.f32 %v3516_v39, %v3516_v39 }
 0x375   : > { %1364 = vrot.lane.b32.xlu0 %v3474_v3, %s2601_s2 }
 0x377   : > { %1366 = vrot.lane.b32.xlu1 %v3481_v22, %s2601_s2 }
 0x379   : > { %1368 = vrot.lane.b32.xlu0 %v3484_v23, %s2601_s2 }
 0x37b   : > { %1370 = vrot.lane.b32.xlu1 %v3491_v24, %s2601_s2 }
 0x37d   : > { %1612 = vrot.lane.b32.xlu0 %v1580_v26, %s2601_s2 }
 0x37f   : > { %1614 = vrot.lane.b32.xlu1 %v1581_v13, %s2601_s2 }
 0x381   : > { %1616 = vrot.lane.b32.xlu0 %v1582_v29, %s2601_s2 }
 0x383   : > { %1618 = vrot.lane.b32.xlu1 %v1583_v18, %s2601_s2 }
 0x3b7   : > { %v1509_v53 = vpop.permute.xlu0 %1508 }
 0x3b8   : > { %v3519_v12 = vsub.f32 %v3358_v6, %v1509_v53 }
 0x3b9   : > { %v1511_v57 = vpop.permute.xlu1 %1510 }
 0x3ba   : > { %v1584_v34 = vmul.f32 %v3519_v12, %v3519_v12  ;;  %v3528_v33 = vsub.f32 %v3365_v32, %v1511_v57 }
 0x3bb   : > { %v1513_v40 = vpop.permute.xlu0 %1512 }
 0x3bc   : > { %v3531_v5 = vsub.f32 %v3368_v21, %v1513_v40  ;;  %1620 = vrot.lane.b32.xlu0 %v1584_v34, %s2601_s2  ;;  %v1585_v6 = vmul.f32 %v3528_v33, %v3528_v33 }
 0x3bd   : > { %v1515_v10 = vpop.permute.xlu1 %1514 }
 0x3be   : > { %v1586_v41 = vmul.f32 %v3531_v5, %v3531_v5  ;;  %v3540_v48 = vsub.f32 %v3375_v42, %v1515_v10  ;;  %1622 = vrot.lane.b32.xlu1 %v1585_v6, %s2601_s2 }
 0x3bf   : > { %v1517_v47 = vpop.permute.xlu0 %1516 }
 0x3c0   : > { %v3543_v32 = vsub.f32 %v3378_v38, %v1517_v47  ;;  %1624 = vrot.lane.b32.xlu0 %v1586_v41, %s2601_s2  ;;  %v1587_v21 = vmul.f32 %v3540_v48, %v3540_v48 }
 0x3c1   : > { %v1519_v50 = vpop.permute.xlu1 %1518 }
 0x3c2   : > { %v1588_v19 = vmul.f32 %v3543_v32, %v3543_v32  ;;  %v3552_v52 = vsub.f32 %v3385_v51, %v1519_v50  ;;  %1626 = vrot.lane.b32.xlu1 %v1587_v21, %s2601_s2 }
 0x3c3   : > { %v1521_v37 = vpop.permute.xlu0 %1520 }
 0x3c4   : > { %v3555_v42 = vsub.f32 %v3388_v55, %v1521_v37  ;;  %1628 = vrot.lane.b32.xlu0 %v1588_v19, %s2601_s2  ;;  %v1589_v38 = vmul.f32 %v3552_v52, %v3552_v52 }
 0x3c5   : > { %v1523_v56 = vpop.permute.xlu1 %1522 }
 0x3c6   : > { %v1590_v54 = vmul.f32 %v3555_v42, %v3555_v42  ;;  %v3564_v44 = vsub.f32 %v3395_v58, %v1523_v56  ;;  %1630 = vrot.lane.b32.xlu1 %v1589_v38, %s2601_s2 }
 0x3c7   : > { %v1525_v14 = vpop.permute.xlu0 %1524 }
 0x3c8   : > { %v3567_v51 = vsub.f32 %v3398_v62, %v1525_v14  ;;  %1632 = vrot.lane.b32.xlu0 %v1590_v54, %s2601_s2  ;;  %v1591_v55 = vmul.f32 %v3564_v44, %v3564_v44 }
 0x3c9   : > { %v1527_v63 = vpop.permute.xlu1 %1526 }
 0x3ca   : > { %v1592_v60 = vmul.f32 %v3567_v51, %v3567_v51  ;;  %v3576_v45 = vsub.f32 %v3405_v61, %v1527_v63  ;;  %1634 = vrot.lane.b32.xlu1 %v1591_v55, %s2601_s2 }
 0x3cb   : > { %v1529_v0 = vpop.permute.xlu0 %1528 }
 0x3cc   : > { %v3579_v58 = vsub.f32 %v3408_v17, %v1529_v0  ;;  %1636 = vrot.lane.b32.xlu0 %v1592_v60, %s2601_s2  ;;  %v1593_v62 = vmul.f32 %v3576_v45, %v3576_v45 }
 0x3cd   : > { %v1531_v25 = vpop.permute.xlu1 %1530 }
 0x3ce   : > { %v1594_v46 = vmul.f32 %v3579_v58, %v3579_v58  ;;  %v3588_v26 = vsub.f32 %v3417_v28, %v1531_v25  ;;  %1638 = vrot.lane.b32.xlu1 %v1593_v62, %s2601_s2 }
 0x3cf   : > { %v1341_v17 = vpop.permute.xlu0 %1340 }
 0x3d0   : > { %1640 = vrot.lane.b32.xlu0 %v1594_v46, %s2601_s2  ;;  %v1595_v61 = vmul.f32 %v3588_v26, %v3588_v26  ;;  %v3600_v47 = vadd.f32 %v1341_v17, %v3411_v30 }
 0x3d1   : > { %v1343_v43 = vpop.permute.xlu1 %1342 }
 0x3d2   : > { %1642 = vrot.lane.b32.xlu1 %v1595_v61, %s2601_s2  ;;  %v3605_v19 = vadd.f32 %v1343_v43, %v3424_v7  ;;  %v1564_v37 = vmul.f32 %v3600_v47, %v3600_v47 }
 0x3d3   : > { %v1345_v4 = vpop.permute.xlu0 %1344 }
 0x3d4   : > { %v3608_v50 = vadd.f32 %v1345_v4, %v3421_v16  ;;  %v1565_v14 = vmul.f32 %v3605_v19, %v3605_v19 }
 0x3d5   : > { %v1347_v13 = vpop.permute.xlu1 %1346 }
 0x3d6   : > { %v3613_v56 = vadd.f32 %v1347_v13, %v3431_v20  ;;  %v1566_v16 = vmul.f32 %v3608_v50, %v3608_v50 }
 0x3d7   : > { %v1349_v29 = vpop.permute.xlu0 %1348 }
 0x3d8   : > { %v3616_v30 = vadd.f32 %v1349_v29, %v3434_v27  ;;  %v1567_v20 = vmul.f32 %v3613_v56, %v3613_v56 }
 0x3d9   : > { %v1351_v35 = vpop.permute.xlu1 %1350 }
 0x3da   : > { %v3624_v62 = vadd.f32 %v1351_v35, %v3441_v2  ;;  %v1568_v61 = vmul.f32 %v3616_v30, %v3616_v30 }
 0x3db   : > { %v1353_v53 = vpop.permute.xlu0 %1352 }
 0x3dc   : > { %v3629_v27 = vadd.f32 %v1353_v53, %v3444_v49  ;;  %v1569_v49 = vmul.f32 %v3624_v62, %v3624_v62 }
 0x3dd   : > { %v1355_v18 = vpop.permute.xlu1 %1354 }
 0x3de   : > { %v3636_v13 = vadd.f32 %v1355_v18, %v3451_v8 }
 0x3df   : > { %v1357_v34 = vpop.permute.xlu0 %1356 }
 0x3e0   : > { %v3641_v29 = vadd.f32 %v1357_v34, %v3454_v9  ;;  %v1571_v9 = vmul.f32 %v3636_v13, %v3636_v13 }
 0x3e1   : > { %v1359_v28 = vpop.permute.xlu1 %1358 }
 0x3e2   : > { %v3648_v18 = vadd.f32 %v1359_v28, %v3461_v1 }
 0x3e3   : > { %v1361_v57 = vpop.permute.xlu0 %1360 }
 0x3e4   : > { %v3653_v34 = vadd.f32 %v1361_v57, %v3464_v11  ;;  %v1573_v11 = vmul.f32 %v3648_v18, %v3648_v18 }
 0x3e5   : > { %v1363_v40 = vpop.permute.xlu1 %1362 }
 0x3e6   : > { %v3660_v28 = vadd.f32 %v1363_v40, %v3471_v36 }
 0x3e7   : > { %v1365_v6 = vpop.permute.xlu0 %1364 }
 0x3e8   : > { %v3665_v57 = vadd.f32 %v1365_v6, %v3474_v3  ;;  %v1575_v3 = vmul.f32 %v3660_v28, %v3660_v28 }
 0x3e9   : > { %v3595_v41 = vpop.permute.xlu1 %1366 }
 0x3ea   : > { %v3673_v40 = vadd.f32 %v3595_v41, %v3481_v22 }
 0x3eb   : > { %v3597_v10 = vpop.permute.xlu0 %1368 }
 0x3ec   : > { %v3679_v6 = vadd.f32 %v3597_v10, %v3484_v23 }
 0x3ed   : > { %v3602_v21 = vpop.permute.xlu1 %1370 }
 0x3ee   : > { %v3689_v23 = vadd.f32 %v3602_v21, %v3491_v24 }
 0x3ef   : > { %v1613_v38 = vpop.permute.xlu0 %1612 }
 0x3f0   : > { %v1660_v54 = vadd.f32 %v1613_v38, %v1564_v37  ;;  %v1570_v37 = vmul.f32 %v3629_v27, %v3629_v27 }
 0x3f1   : > { %v1615_v55 = vpop.permute.xlu1 %1614 }
 0x3f2   : > { %v1677_v7 = vsel %vm1676_vm3, %v1660_v54, 0.0  ;;  %v1661_v63 = vadd.f32 %v1615_v55, %v1565_v14  ;;  %v1572_v55 = vmul.f32 %v3641_v29, %v3641_v29 }
 0x3f3   : > { %1678 = vadd.xlane.f32.xlu0 %v1677_v7  ;;  %v1617_v60 = vpop.permute.xlu0 %1616 }
 0x3f4   : > { %v1662_v0 = vadd.f32 %v1617_v60, %v1566_v16  ;;  %v1680_v46 = vsel %vm1676_vm3, %v1661_v63, 0.0 }
 0x3f5   : > { %v1619_v17 = vpop.permute.xlu1 %1618 }
 0x3f6   : > { %v1683_v25 = vsel %vm1676_vm3, %v1662_v0, 0.0  ;;  %1681 = vadd.xlane.f32.xlu1 %v1680_v46  ;;  %v1663_v4 = vadd.f32 %v1619_v17, %v1567_v20 }
 0x3f7   : > { %1684 = vadd.xlane.f32.xlu0 %v1683_v25  ;;  %v1574_v25 = vmul.f32 %v3653_v34, %v3653_v34 }
 0x3f8   : > { %v1686_v35 = vsel %vm1676_vm3, %v1663_v4, 0.0 }
 0x3fb   : > { %1687 = vadd.xlane.f32.xlu0 %v1686_v35 }
 0x42e   : > { %v1621_v43 = vpop.permute.xlu0 %1620 }
 0x42f   : > { %v1664_v2 = vadd.f32 %v1621_v43, %v1568_v61 }
 0x430   : > { %v1623_v38 = vpop.permute.xlu1 %1622 }
 0x431   : > { %v1689_v53 = vsel %vm1676_vm3, %v1664_v2, 0.0  ;;  %v1665_v14 = vadd.f32 %v1623_v38, %v1569_v49  ;;  %v1576_v49 = vmul.f32 %v3665_v57, %v3665_v57 }
 0x432   : > { %1690 = vadd.xlane.f32.xlu1 %v1689_v53  ;;  %v1625_v54 = vpop.permute.xlu0 %1624 }
 0x433   : > { %v1666_v8 = vadd.f32 %v1625_v54, %v1570_v37  ;;  %v1692_v7 = vsel %vm1676_vm3, %v1665_v14, 0.0  ;;  %v1577_v37 = vmul.f32 %v3673_v40, %v3673_v40  ;;  %v1578_v54 = vmul.f32 %v3679_v6, %v3679_v6 }
 0x434   : > { %v1627_v60 = vpop.permute.xlu1 %1626  ;;  %1693 = vadd.xlane.f32.xlu0 %v1692_v7 }
 0x435   : > { %v1695_v16 = vsel %vm1676_vm3, %v1666_v8, 0.0  ;;  %v1667_v0 = vadd.f32 %v1627_v60, %v1571_v9 }
 0x436   : > { %1696 = vadd.xlane.f32.xlu1 %v1695_v16  ;;  %v1629_v63 = vpop.permute.xlu0 %1628  ;;  %v1579_v16 = vmul.f32 %v3689_v23, %v3689_v23 }
 0x437   : > { %v1668_v1 = vadd.f32 %v1629_v63, %v1572_v55  ;;  %v1698_v20 = vsel %vm1676_vm3, %v1667_v0, 0.0 }
 0x438   : > { %v1631_v61 = vpop.permute.xlu1 %1630  ;;  %1699 = vadd.xlane.f32.xlu0 %v1698_v20 }
 0x439   : > { %v1701_v46 = vsel %vm1676_vm3, %v1668_v1, 0.0  ;;  %v1669_v43 = vadd.f32 %v1631_v61, %v1573_v11 }
 0x43a   : > { %1702 = vadd.xlane.f32.xlu1 %v1701_v46  ;;  %v1633_v17 = vpop.permute.xlu0 %1632 }
 0x43b   : > { %v1670_v36 = vadd.f32 %v1633_v17, %v1574_v25  ;;  %v1704_v4 = vsel %vm1676_vm3, %v1669_v43, 0.0 }
 0x43c   : > { %v1635_v35 = vpop.permute.xlu1 %1634  ;;  %1705 = vadd.xlane.f32.xlu0 %v1704_v4 }
 0x43d   : > { %v1707_v2 = vsel %vm1676_vm3, %v1670_v36, 0.0  ;;  %v1671_v22 = vadd.f32 %v1635_v35, %v1575_v3  ;;  %v1789_v36 = vld [vmem:[%s2886_s17] sm:$0xff] }
 0x43e   : > { %1708 = vadd.xlane.f32.xlu1 %v1707_v2  ;;  %v1637_v53 = vpop.permute.xlu0 %1636 }
 0x43f   : > { %v1672_v41 = vadd.f32 %v1637_v53, %v1576_v49  ;;  %v1710_v10 = vsel %vm1676_vm3, %v1671_v22, 0.0 }
 0x440   : > { %v1639_v14 = vpop.permute.xlu1 %1638  ;;  %1711 = vadd.xlane.f32.xlu0 %v1710_v10  ;;  %v1790_v10 = vld [vmem:[%s2886_s17 + $0x8] sm:$0xff] }
 0x441   : > { %v1713_v38 = vsel %vm1676_vm3, %v1672_v41, 0.0  ;;  %v1673_v9 = vadd.f32 %v1639_v14, %v1577_v37 }
 0x442   : > { %1714 = vadd.xlane.f32.xlu1 %v1713_v38  ;;  %v1641_v8 = vpop.permute.xlu0 %1640 }
 0x443   : > { %v1674_v7 = vadd.f32 %v1641_v8, %v1578_v54  ;;  %v1716_v55 = vsel %vm1676_vm3, %v1673_v9, 0.0  ;;  %v1791_v54 = vld [vmem:[%s2886_s17 + $0x10] sm:$0xff] }
 0x444   : > { %v1643_v21 = vpop.permute.xlu1 %1642  ;;  %1717 = vadd.xlane.f32.xlu0 %v1716_v55 }
 0x445   : > { %v1719_v24 = vsel %vm1676_vm3, %v1674_v7, 0.0  ;;  %v1675_v60 = vadd.f32 %v1643_v21, %v1579_v16 }
 0x446   : > { %1720 = vadd.xlane.f32.xlu1 %v1719_v24 }
 0x447   : > { %v1722_v63 = vsel %vm1676_vm3, %v1675_v60, 0.0 }
 0x448   : > { %1723 = vadd.xlane.f32.xlu0 %v1722_v63  ;;  %v1793_v63 = vld [vmem:[%s2886_s17 + $0x20] sm:$0xff] }
 0x480   : > { %v1679_v0 = vpop.xlane.xlu0 %1678 }
 0x481   : > { %2355 = vrsqrt.f32 %v1679_v0 }
 0x483   : > { %v1682_v1 = vpop.xlane.xlu1 %1681 }
 0x484   : > { %v1685_v11 = vpop.xlane.xlu0 %1684  ;;  %2357 = vrsqrt.f32 %v1682_v1  ;;  %v1792_v1 = vld [vmem:[%s2886_s17 + $0x18] sm:$0xff] }
 0x485   : > { %2359 = vrsqrt.f32 %v1685_v11 }
 0x488   : > { %v1688_v46 = vpop.xlane.xlu0 %1687 }
 0x48b   : > { %v2356_v25 = vpop.eup %2355 }
 0x48c   : > { %v1741_v61 = vmul.f32 8.0, %v2356_v25 }
 0x48e   : > { %v1757_v3 = vmul.f32 %v1741_v61, %v3600_v47  ;;  %v1773_v4 = vmul.f32 %v1741_v61, %v3500_v59  ;;  %v2358_v2 = vpop.eup %2357 }
 0x48f   : > { %v2360_v49 = vpop.eup %2359  ;;  %v1742_v22 = vmul.f32 8.0, %v2358_v2 }
 0x490   : > { %v1805_v35 = vadd.f32 %v1789_v36, %v1757_v3  ;;  %v1821_v53 = vadd.f32 %v1789_v36, %v1773_v4  ;;  %v1743_v38 = vmul.f32 8.0, %v2360_v49  ;;  %v1795_v4 = vld [vmem:[%s2886_s17 + $0x30] sm:$0xff]  ;;  %v1794_v49 = vld [vmem:[%s2886_s17 + $0x28] sm:$0xff] }
 0x491   : > { %v1758_v47 = vmul.f32 %v1742_v22, %v3605_v19  ;;  %v1774_v59 = vmul.f32 %v1742_v22, %v3505_v15 }
 0x492   : > { %1837 = vst.msk [vmem:[%s2948_s24] sm:$0xff] %vm1676_vm3, %v1805_v35  ;;  %v1759_v8 = vmul.f32 %v1743_v38, %v3608_v50  ;;  %v1775_v9 = vmul.f32 %v1743_v38, %v3508_v31 }
 0x493   : > { %1854 = vst.msk [vmem:[%s2948_s24] sm:$0xff] %vm1853_vm4, %v1821_v53  ;;  %v1806_v16 = vadd.f32 %v1790_v10, %v1758_v47  ;;  %v1822_v55 = vadd.f32 %v1790_v10, %v1774_v59 }
 0x494   : > { %v1807_v15 = vadd.f32 %v1791_v54, %v1759_v8  ;;  %v1823_v60 = vadd.f32 %v1791_v54, %v1775_v9  ;;  %v1797_v54 = vld [vmem:[%s2886_s17 + $0x40] sm:$0xff]  ;;  %v1796_v8 = vld [vmem:[%s2886_s17 + $0x38] sm:$0xff] }
 0x495   : > { %1838 = vst.msk [vmem:[%s2948_s24 + $0x8] sm:$0xff] %vm1676_vm3, %v1806_v16 }
 0x496   : > { %1855 = vst.msk [vmem:[%s2948_s24 + $0x8] sm:$0xff] %vm1853_vm4, %v1822_v55 }
 0x497   : > { %1839 = vst.msk [vmem:[%s2948_s24 + $0x10] sm:$0xff] %vm1676_vm3, %v1807_v15 }
 0x498   : > { %1856 = vst.msk [vmem:[%s2948_s24 + $0x10] sm:$0xff] %vm1853_vm4, %v1823_v60  ;;  %v1799_v60 = vld [vmem:[%s2886_s17 + $0x50] sm:$0xff] }
 0x4bf   : > { %v1691_v20 = vpop.xlane.xlu1 %1690 }
 0x4c0   : > { %2361 = vrsqrt.f32 %v1691_v20 }
 0x4c1   : > { %2363 = vrsqrt.f32 %v1688_v46  ;;  %v1694_v43 = vpop.xlane.xlu0 %1693 }
 0x4c3   : > { %v1697_v17 = vpop.xlane.xlu1 %1696 }
 0x4c4   : > { %2365 = vrsqrt.f32 %v1697_v17 }
 0x4c5   : > { %2367 = vrsqrt.f32 %v1694_v43  ;;  %v1700_v37 = vpop.xlane.xlu0 %1699 }
 0x4c7   : > { %v1703_v41 = vpop.xlane.xlu1 %1702 }
 0x4c8   : > { %2369 = vrsqrt.f32 %v1703_v41 }
 0x4c9   : > { %2371 = vrsqrt.f32 %v1700_v37  ;;  %v1706_v21 = vpop.xlane.xlu0 %1705 }
 0x4ca   : > { %v2362_v14 = vpop.eup %2361 }
 0x4cb   : > { %v2364_v7 = vpop.eup %2363  ;;  %v1745_v19 = vmul.f32 8.0, %v2362_v14  ;;  %v1709_v24 = vpop.xlane.xlu1 %1708 }
 0x4cc   : > { %v1744_v0 = vmul.f32 8.0, %v2364_v7  ;;  %2373 = vrsqrt.f32 %v1709_v24 }
 0x4cd   : > { %v1761_v50 = vmul.f32 %v1745_v19, %v3616_v30  ;;  %v1777_v31 = vmul.f32 %v1745_v19, %v3519_v12  ;;  %2375 = vrsqrt.f32 %v1706_v21  ;;  %v1712_v43 = vpop.xlane.xlu0 %1711 }
 0x4ce   : > { %v2366_v11 = vpop.eup %2365  ;;  %v1760_v20 = vmul.f32 %v1744_v0, %v3613_v56  ;;  %v1776_v46 = vmul.f32 %v1744_v0, %v3516_v39  ;;  %v1798_v0 = vld [vmem:[%s2886_s17 + $0x48] sm:$0xff] }
 0x4cf   : > { %v2368_v25 = vpop.eup %2367  ;;  %v1809_v30 = vadd.f32 %v1793_v63, %v1761_v50  ;;  %v1825_v12 = vadd.f32 %v1793_v63, %v1777_v31  ;;  %v1747_v61 = vmul.f32 8.0, %v2366_v11  ;;  %v1715_v17 = vpop.xlane.xlu1 %1714 }
 0x4d0   : > { %v1808_v36 = vadd.f32 %v1792_v1, %v1760_v20  ;;  %v1824_v3 = vadd.f32 %v1792_v1, %v1776_v46  ;;  %v1746_v2 = vmul.f32 8.0, %v2368_v25  ;;  %2377 = vrsqrt.f32 %v1715_v17 }
 0x4d1   : > { %1841 = vst.msk [vmem:[%s2948_s24 + $0x20] sm:$0xff] %vm1676_vm3, %v1809_v30  ;;  %v1763_v39 = vmul.f32 %v1747_v61, %v3629_v27  ;;  %v1779_v56 = vmul.f32 %v1747_v61, %v3531_v5  ;;  %2379 = vrsqrt.f32 %v1712_v43  ;;  %v1718_v38 = vpop.xlane.xlu0 %1717  ;;  %v1801_v30 = vld [vmem:[%s2886_s17 + $0x60] sm:$0xff] }
 0x4d2   : > { %v2370_v35 = vpop.eup %2369  ;;  %1858 = vst.msk [vmem:[%s2948_s24 + $0x20] sm:$0xff] %vm1853_vm4, %v1825_v12  ;;  %v1762_v53 = vmul.f32 %v1746_v2, %v3624_v62  ;;  %v1778_v22 = vmul.f32 %v1746_v2, %v3528_v33 }
 0x4d3   : > { %1840 = vst.msk [vmem:[%s2948_s24 + $0x18] sm:$0xff] %vm1676_vm3, %v1808_v36  ;;  %v2372_v41 = vpop.eup %2371  ;;  %v1811_v27 = vadd.f32 %v1795_v4, %v1763_v39  ;;  %v1827_v5 = vadd.f32 %v1795_v4, %v1779_v56  ;;  %v1749_v37 = vmul.f32 8.0, %v2370_v35  ;;  %v1721_v10 = vpop.xlane.xlu1 %1720  ;;  %v1803_v56 = vld [vmem:[%s2886_s17 + $0x70] sm:$0xff]  ;;  %v1802_v35 = vld [vmem:[%s2886_s17 + $0x68] sm:$0xff] }
 0x4d4   : > { %1857 = vst.msk [vmem:[%s2948_s24 + $0x18] sm:$0xff] %vm1853_vm4, %v1824_v3  ;;  %v1810_v47 = vadd.f32 %v1794_v49, %v1762_v53  ;;  %v1826_v59 = vadd.f32 %v1794_v49, %v1778_v22  ;;  %v1748_v14 = vmul.f32 8.0, %v2372_v41  ;;  %2381 = vrsqrt.f32 %v1721_v10  ;;  %v1804_v10 = vld [vmem:[%s2886_s17 + $0x78] sm:$0xff] }
 0x4d5   : > { %1843 = vst.msk [vmem:[%s2948_s24 + $0x30] sm:$0xff] %vm1676_vm3, %v1811_v27  ;;  %v1765_v33 = vmul.f32 %v1749_v37, %v3641_v29  ;;  %v1781_v62 = vmul.f32 %v1749_v37, %v3543_v32  ;;  %2383 = vrsqrt.f32 %v1718_v38  ;;  %v1724_v24 = vpop.xlane.xlu0 %1723 }
 0x4d6   : > { %v2374_v9 = vpop.eup %2373  ;;  %1860 = vst.msk [vmem:[%s2948_s24 + $0x30] sm:$0xff] %vm1853_vm4, %v1827_v5  ;;  %v1764_v7 = vmul.f32 %v1748_v14, %v3636_v13  ;;  %v1780_v16 = vmul.f32 %v1748_v14, %v3540_v48  ;;  %2385 = vrsqrt.f32 %v1724_v24 }
 0x4d7   : > { %1842 = vst.msk [vmem:[%s2948_s24 + $0x28] sm:$0xff] %vm1676_vm3, %v1810_v47  ;;  %v2376_v55 = vpop.eup %2375  ;;  %v1813_v32 = vadd.f32 %v1797_v54, %v1765_v33  ;;  %v1829_v29 = vadd.f32 %v1797_v54, %v1781_v62  ;;  %v1751_v19 = vmul.f32 8.0, %v2374_v9 }
 0x4d8   : > { %1859 = vst.msk [vmem:[%s2948_s24 + $0x28] sm:$0xff] %vm1853_vm4, %v1826_v59  ;;  %v1812_v21 = vadd.f32 %v1796_v8, %v1764_v7  ;;  %v1828_v15 = vadd.f32 %v1796_v8, %v1780_v16  ;;  %v1750_v63 = vmul.f32 8.0, %v2376_v55 }
 0x4d9   : > { %1845 = vst.msk [vmem:[%s2948_s24 + $0x40] sm:$0xff] %vm1676_vm3, %v1813_v32  ;;  %v1767_v48 = vmul.f32 %v1751_v19, %v3653_v34  ;;  %v1783_v13 = vmul.f32 %v1751_v19, %v3555_v42 }
 0x4da   : > { %v2378_v50 = vpop.eup %2377  ;;  %1862 = vst.msk [vmem:[%s2948_s24 + $0x40] sm:$0xff] %vm1853_vm4, %v1829_v29  ;;  %v1766_v31 = vmul.f32 %v1750_v63, %v3648_v18  ;;  %v1782_v1 = vmul.f32 %v1750_v63, %v3552_v52  ;;  %v1800_v52 = vld [vmem:[%s2886_s17 + $0x58] sm:$0xff] }
 0x4db   : > { %1844 = vst.msk [vmem:[%s2948_s24 + $0x38] sm:$0xff] %vm1676_vm3, %v1812_v21  ;;  %v2380_v11 = vpop.eup %2379  ;;  %v1815_v34 = vadd.f32 %v1799_v60, %v1767_v48  ;;  %v1831_v20 = vadd.f32 %v1799_v60, %v1783_v13  ;;  %v1753_v42 = vmul.f32 8.0, %v2378_v50 }
 0x4dc   : > { %1861 = vst.msk [vmem:[%s2948_s24 + $0x38] sm:$0xff] %vm1853_vm4, %v1828_v15  ;;  %v1814_v46 = vadd.f32 %v1798_v0, %v1766_v31  ;;  %v1830_v25 = vadd.f32 %v1798_v0, %v1782_v1  ;;  %v1752_v12 = vmul.f32 8.0, %v2380_v11 }
 0x4dd   : > { %1847 = vst.msk [vmem:[%s2948_s24 + $0x50] sm:$0xff] %vm1676_vm3, %v1815_v34  ;;  %v1769_v18 = vmul.f32 %v1753_v42, %v3665_v57  ;;  %v1785_v61 = vmul.f32 %v1753_v42, %v3567_v51 }
 0x4de   : > { %v2382_v17 = vpop.eup %2381  ;;  %1864 = vst.msk [vmem:[%s2948_s24 + $0x50] sm:$0xff] %vm1853_vm4, %v1831_v20  ;;  %v1768_v43 = vmul.f32 %v1752_v12, %v3660_v28  ;;  %v1784_v36 = vmul.f32 %v1752_v12, %v3564_v44 }
 0x4df   : > { %1846 = vst.msk [vmem:[%s2948_s24 + $0x48] sm:$0xff] %vm1676_vm3, %v1814_v46  ;;  %v2384_v3 = vpop.eup %2383  ;;  %v1817_v57 = vadd.f32 %v1801_v30, %v1769_v18  ;;  %v1833_v51 = vadd.f32 %v1801_v30, %v1785_v61  ;;  %v1755_v4 = vmul.f32 8.0, %v2382_v17 }
 0x4e0   : > { %1863 = vst.msk [vmem:[%s2948_s24 + $0x48] sm:$0xff] %vm1853_vm4, %v1830_v25  ;;  %v1816_v2 = vadd.f32 %v1800_v52, %v1768_v43  ;;  %v1832_v39 = vadd.f32 %v1800_v52, %v1784_v36  ;;  %v1754_v49 = vmul.f32 8.0, %v2384_v3  ;;  %v2386_v53 = vpop.eup %2385 }
 0x4e1   : > { %1849 = vst.msk [vmem:[%s2948_s24 + $0x60] sm:$0xff] %vm1676_vm3, %v1817_v57  ;;  %v1771_v28 = vmul.f32 %v1755_v4, %v3679_v6  ;;  %v1787_v44 = vmul.f32 %v1755_v4, %v3579_v58  ;;  %v1756_v58 = vmul.f32 8.0, %v2386_v53 }
 0x4e2   : > { %1866 = vst.msk [vmem:[%s2948_s24 + $0x60] sm:$0xff] %vm1853_vm4, %v1833_v51  ;;  %v1770_v22 = vmul.f32 %v1754_v49, %v3673_v40  ;;  %v1786_v41 = vmul.f32 %v1754_v49, %v3576_v45 }
 0x4e3   : > { %1848 = vst.msk [vmem:[%s2948_s24 + $0x58] sm:$0xff] %vm1676_vm3, %v1816_v2  ;;  %v1819_v6 = vadd.f32 %v1803_v56, %v1771_v28  ;;  %v1835_v27 = vadd.f32 %v1803_v56, %v1787_v44  ;;  %v1772_v38 = vmul.f32 %v1756_v58, %v3689_v23  ;;  %v1788_v47 = vmul.f32 %v1756_v58, %v3588_v26 }
 0x4e4   : > { %1865 = vst.msk [vmem:[%s2948_s24 + $0x58] sm:$0xff] %vm1853_vm4, %v1832_v39  ;;  %v1818_v5 = vadd.f32 %v1802_v35, %v1770_v22  ;;  %v1834_v37 = vadd.f32 %v1802_v35, %v1786_v41 }
 0x4e5   : > { %1851 = vst.msk [vmem:[%s2948_s24 + $0x70] sm:$0xff] %vm1676_vm3, %v1819_v6  ;;  %v1820_v45 = vadd.f32 %v1804_v10, %v1772_v38  ;;  %v1836_v40 = vadd.f32 %v1804_v10, %v1788_v47 }
 0x4e6   : > { %1868 = vst.msk [vmem:[%s2948_s24 + $0x70] sm:$0xff] %vm1853_vm4, %v1835_v27 }
 0x4e7   : > { %1850 = vst.msk [vmem:[%s2948_s24 + $0x68] sm:$0xff] %vm1676_vm3, %v1818_v5  ;;  %1852 = vst.msk [vmem:[%s2948_s24 + $0x78] sm:$0xff] %vm1676_vm3, %v1820_v45 }
 0x4e8   : > { %1867 = vst.msk [vmem:[%s2948_s24 + $0x68] sm:$0xff] %vm1853_vm4, %v1834_v37  ;;  %1869 = vst.msk [vmem:[%s2948_s24 + $0x78] sm:$0xff] %vm1853_vm4, %v1836_v40 }
 0x4e9 PF: > { %s3957_s17 = sld [smem:[#allocation14_spill]]  ;;  %s3958_s11 = sld [smem:[#allocation19_spill]] }
 0x4ea   : > { %s1886_s25 = sshll.u32 %s2948_s24, 4  ;;  %s3959_s14 = sld [smem:[#allocation25_spill]]  ;;  %s3815_s25 = int_to_ptr.vmem [resolvable:$true] %s1886_s25 }
 0x4eb   : > { %s1871_s16 = scalar_lea.sflag [#allocation5], %s2880_s18  ;;  %s2447_s3 = scalar_lea.vmem %s3815_s25, 2048 }
 0x4ec   : > { %p2448_p8 = scmp.ne.s32.totalorder %s3815_s25, %s2447_s3  ;;  %s2602_s1 = smov [#allocation8]  }
 0x4ef   : > { %s2098_s0 = sshll.u32 %s3957_s17, 5  ;;  %p3960_p10 = scmp.ne.s32.totalorder %s3958_s11, 0 }
 0x4f0   : > { %s1883_s26 = sadd.s32 %s2098_s0, %s2893_s27  ;;  %s2451_s27 = sshll.u32 %s2602_s1, 4  ;;  %s2452_s27 = int_to_ptr.vmem [resolvable:$false] %s2451_s27 }
 0x4f1   : > { %s2099_s10 = sshll.u32 %s1883_s26, 7  ;;  %p2449_p4 = pnand %p2448_p8, %p3960_p10 }
 0x4f2   : > { %s3820_s6 = scalar_lea.hbm %s3959_s14, %s2099_s10  ;;  %s2453_s24 = scalar_lea.vmem %s2452_s27, 4096 }
 0x4f3   : > { %p2450_p11 = pneg %p2449_p4  ;;  %p2454_p12 = scmp.lt.s32.totalorder %s3815_s25, %s2452_s27 }
 0x4f4   : > { %p2455_p1 = scmp.lt.s32.totalorder %s2453_s24, %s2447_s3 }
 0x4f6   : > { %p2456_p5 = por %p2455_p1, %p2454_p12 }
 0x4f8   : > { %p2457_p13 = pnand %p2456_p5, %p2450_p11 }
 0x4fa   : > { %2460 = shalt.err (!%p2457_p13)
}
 0x4fb   : > { %s2461_s7 = scalar_lea.hbm %s3820_s6, 2048  ;;  %s2465_s8 = scalar_lea.hbm %s3959_s14, 8192 }
 0x4fc   : > { %p2462_p6 = scmp.ne.s32.totalorder %s3820_s6, %s2461_s7  ;;  %p2466_p7 = scmp.lt.u32.totalorder %s3820_s6, %s3959_s14 }
 0x4fd   : > { %p2467_p9 = scmp.lt.u32.totalorder %s2465_s8, %s2461_s7  ;;  %p2469_p8 = scmp.lt.u32.totalorder %s2461_s7, %s3820_s6 }
 0x4fe   : > { %p2463_p2 = pnand %p2462_p6, %p3960_p10 }
 0x4ff   : > { %p2468_p0 = por %p2467_p9, %p2466_p7 }
 0x500   : > { %p2464_p3 = pneg %p2463_p2 }
 0x501   : > { %p2470_p4 = por %p2469_p8, %p2468_p0 }
 0x503   : > { %p2471_p11 = pnand %p2470_p4, %p2464_p3 }
 0x505   : > { %2474 = shalt.err (!%p2471_p11)
}
 0x506   : > { %s2603_s0 = smov 128   ;;  %s2604_s26 = smov 8  }
 0x507   : > { %2171 = dma.vmem_to_hbm [thread:$0]  (%p3960_p10), %s3815_s25, 2048, %s3820_s6, %s1871_s16, %s2603_s0, %s2603_s0, %s2604_s26  }
 0x508 PF: > { %s3961_s10 = sld [smem:[#allocation12_spill]]  ;;  %s3962_s28 = sld [smem:[#allocation20_spill]] }
 0x509   : > { %p2185_p12 = scmp.ge.s32.totalorder %s2589_s30, 2 }
 0x50e   : > { %s1901_s12 = sand.u32 1, %s3961_s10   ;;  %p3963_p1 = scmp.ne.s32.totalorder %s3962_s28, 0 }
 0x50f   : > { %s1902_s3 = scalar_lea.sflag [#allocation5], %s1901_s12 }
 0x510   : > { %p2181_p5 = pnand %p2185_p12, %p3963_p1 }
 0x512   : > { %2536 = dma.done.wait (!%p2181_p5), %s1902_s3, 2048  }
 0x513   : > { %2538 = vsyncadd (!%p2181_p5), %s1902_s3, 4294965248  ;;  %s24_s30 = sadd.s32 1, %s2589_s30   ;;  %s3965_s24 = sld [smem:[#allocation15_spill]] }
 0x514   : > { %p3851_p13 = scmp.ge.s32.totalorder %s24_s30, 10   ;;  %s3966_s25 = sld [smem:[#allocation16_spill]] }
 0x515   : > { %s3967_s27 = sld [smem:[#allocation17_spill]]  ;;  %s3968_s28 = sld [smem:[#allocation18_spill]] }
 0x516   : > { %s3969_s11 = smov %s3987_s21  ;;  %s3970_s18 = smov %s2545_s19 }
 0x517   : > { %s3971_s19 = smov %s2549_s20  ;;  %s3972_s20 = smov %s2824_s15 }
 0x518   : > { %s3973_s21 = smov %s2557_s22  ;;  %s3974_s22 = smov %s2561_s23 }
 0x519   : > { %s3975_s23 = smov %s2821_s5  ;;  %s3976_s26 = smov %s2585_s29 }
 0x51a   : > { %s3977_s29 = smov %s3969_s11  ;;  %23 = sbr.rel (!%p3851_p13) target bundleno = 18 (0x12), region = 116 }
 0x521   :  { %1907 = vsyncpa [#allocation4], 1 }
 0x522   :  { %1909 = vsyncpa [#allocation4 + $0x1], 1 }
 0x523   :  { %1910 = vsyncpa [#allocation7], 1 }
 0x524   :  { %1912 = vsyncpa [#allocation7 + $0x1], 1 }
 0x525   :  { %1913 = vsyncpa [#allocation5], 1 }
 0x526   :  { %1915 = vsyncpa [#allocation5 + $0x1], 1 }

</bundles_post_ra>
